<compile_context>
chip_gen: v7x
topology: tpu7x:2x2x1
jax: 0.10.0
libtpu: 0.0.40
codegen_flags: <defaults>
</compile_context>

<pallas_src>
import jax
import jax.numpy as jnp
from jax.experimental import pallas as pl
from jax.experimental.pallas import tpu as pltpu


# ----------------------------- fused Pallas kernel ---------------------------

def _make_wavefront_kernel(num_layers, T, BT, H):
    """Fused LSTM(+Linear head) kernel for static (num_layers, T, BT, H).

    Ref layout (all whole blocks, VMEM resident — total <100 KB):
      refs[0]                    x      (T, BT, Din)  f32
      refs[1+3l .. 3+3l]         w_ih (Din_l,4H) bf16, w_hh (H,4H) bf16, b (1,4H) f32
      refs[1+3L]                 h0     (L, BT, H)    f32
      refs[2+3L]                 c0     (L, BT, H)    f32
      refs[3+3L]                 w_tag  (H, Tgp)      bf16
      refs[4+3L]                 b_tag  (1, Tgp)      f32
      refs[5+3L]                 out    (BT, Tgp)     f32
    """
    L = num_layers

    def kernel(*refs):
        x_ref = refs[0]
        layer_refs = refs[1:1 + 3 * L]
        h0_ref, c0_ref, wtag_ref, btag_ref, out_ref = refs[1 + 3 * L:6 + 3 * L]

        # Hoist weight loads and bias broadcasts out of the fully unrolled
        # loops (JAX does not CSE broadcast_in_dim).
        w_ih = [layer_refs[3 * l][...] for l in range(L)]        # bf16
        w_hh = [layer_refs[3 * l + 1][...] for l in range(L)]    # bf16
        bias = [jnp.broadcast_to(layer_refs[3 * l + 2][...], (BT, 4 * H))
                for l in range(L)]                                # f32

        h = [h0_ref[l] for l in range(L)]                         # (BT, H) f32
        c = [c0_ref[l] for l in range(L)]

        # Wavefront: at `step`, layer l works on timestep t = step - l, using
        # layer l-1's output from the previous step.  Snapshot the hidden
        # states so the <=L per-layer chains in this step are independent.
        for step in range(T + L - 1):
            prev_h = list(h)
            for l in range(max(0, step - T + 1), min(L, step + 1)):
                t = step - l
                if l == 0:
                    x_in = x_ref[t].astype(jnp.bfloat16)          # (BT, Din)
                else:
                    x_in = prev_h[l - 1].astype(jnp.bfloat16)     # (BT, H)

                # Two independent bf16 MXU matmuls (f32 accumulate) + bias.
                # TODO(synk): keep w_hh[l] stationary in a dedicated MXU via
                # pltpu.matmul_push_rhs / matmul_acc_lhs across the unrolled
                # recurrence instead of re-pushing the RHS every step.
                gates = (jnp.dot(x_in, w_ih[l],
                                 preferred_element_type=jnp.float32)
                         + jnp.dot(prev_h[l].astype(jnp.bfloat16), w_hh[l],
                                   preferred_element_type=jnp.float32)
                         + bias[l])                               # (BT, 4H) f32

                # i/f/o weight columns were pre-scaled by 0.5 at pack time, so
                # ONE full-tile tanh yields both the sigmoid gates
                # (0.5*tanh(x/2)+0.5) and the g-gate tanh.
                tg = jnp.tanh(gates)
                i_g = 0.5 * tg[:, 0 * H:1 * H] + 0.5
                f_g = 0.5 * tg[:, 1 * H:2 * H] + 0.5
                g_g = tg[:, 2 * H:3 * H]
                o_g = 0.5 * tg[:, 3 * H:4 * H] + 0.5

                c[l] = f_g * c[l] + i_g * g_g
                h[l] = o_g * jnp.tanh(c[l])

        # Fused Linear head on the last timestep only; lane-dense output slab.
        out_ref[...] = (jnp.dot(h[L - 1].astype(jnp.bfloat16), wtag_ref[...],
                                preferred_element_type=jnp.float32)
                        + btag_ref[...]).astype(out_ref.dtype)

    return kernel


# ----------------------- parameter packing (done once) -----------------------

def pack_params(params, h0, c0):
    """One-time, per-model preprocessing of constants for the kernel."""
    L, B, H = h0.shape
    Bp = ((B + 7) // 8) * 8            # pad batch to a sublane multiple
    Tg = params["w_tag_t"].shape[1]
    Tgp = ((Tg + 127) // 128) * 128    # lane-dense output slab

    # Fold sigmoid(x) = 0.5*tanh(x/2) + 0.5 into the i/f/o gate columns
    # (exact: power-of-two scale, also exact after the bf16 cast).
    gate_scale = jnp.concatenate([
        jnp.full((H,), 0.5, jnp.float32),   # i
        jnp.full((H,), 0.5, jnp.float32),   # f
        jnp.ones((H,), jnp.float32),        # g
        jnp.full((H,), 0.5, jnp.float32),   # o
    ])

    layers = []
    for lp in params["layers"]:
        layers.append({
            "w_ih": (lp["w_ih_t"] * gate_scale).astype(jnp.bfloat16),
            "w_hh": (lp["w_hh_t"] * gate_scale).astype(jnp.bfloat16),
            "b":    (lp["b"] * gate_scale).astype(jnp.float32),
        })

    return {
        "layers": layers,
        "h0": jnp.pad(h0, ((0, 0), (0, Bp - B), (0, 0))),
        "c0": jnp.pad(c0, ((0, 0), (0, Bp - B), (0, 0))),
        "w_tag": jnp.pad(params["w_tag_t"], ((0, 0), (0, Tgp - Tg))).astype(jnp.bfloat16),
        "b_tag": jnp.pad(params["b_tag"], ((0, 0), (0, Tgp - Tg))).astype(jnp.float32),
        "L": L, "B": B, "Bp": Bp, "H": H, "Tg": Tg, "Tgp": Tgp,
    }


def build_forward(packed, seq_len, batch_block=None):
    """Build a jitted forward(orientations) -> (B, tag_size) closure."""
    L, B, Bp, H = packed["L"], packed["B"], packed["Bp"], packed["H"]
    Tg, Tgp = packed["Tg"], packed["Tgp"]
    T = seq_len
    Din = packed["layers"][0]["w_ih"].shape[0]

    # Batch tiling: default is the whole padded batch in a single tile
    # (grid=(1,)).  For production batch sizes on v7x (2 TensorCores/chip),
    # pass batch_block = Bp // 2 so the "parallel" grid axis shards across
    # both cores; on v5e/v6e (1 TC) leave the default.
    BT = Bp if batch_block is None else batch_block
    assert BT % 8 == 0 and Bp % BT == 0

    in_specs = [pl.BlockSpec((T, BT, Din), lambda i: (0, i, 0))]
    weight_args = []
    for lp in packed["layers"]:
        weight_args += [lp["w_ih"], lp["w_hh"], lp["b"]]
        in_specs += [
            pl.BlockSpec(lp["w_ih"].shape, lambda i: (0, 0)),
            pl.BlockSpec(lp["w_hh"].shape, lambda i: (0, 0)),
            pl.BlockSpec(lp["b"].shape, lambda i: (0, 0)),
        ]
    weight_args += [packed["h0"], packed["c0"], packed["w_tag"], packed["b_tag"]]
    in_specs += [
        pl.BlockSpec((L, BT, H), lambda i: (0, i, 0)),
        pl.BlockSpec((L, BT, H), lambda i: (0, i, 0)),
        pl.BlockSpec(packed["w_tag"].shape, lambda i: (0, 0)),
        pl.BlockSpec(packed["b_tag"].shape, lambda i: (0, 0)),
    ]

    call = pl.pallas_call(
        _make_wavefront_kernel(L, T, BT, H),
        out_shape=jax.ShapeDtypeStruct((Bp, Tgp), jnp.float32),
        grid=(Bp // BT,),
        in_specs=in_specs,
        out_specs=pl.BlockSpec((BT, Tgp), lambda i: (i, 0)),
        compiler_params=pltpu.CompilerParams(
            dimension_semantics=("parallel",)),
    )

    @jax.jit
    def forward(orientations):
        # Only input-dependent work here: time-major transpose + batch pad;
        # all constant prep happened once in pack_params.
        x = jnp.transpose(orientations, (1, 0, 2))
        x = jnp.pad(x, ((0, 0), (0, Bp - B), (0, 0)))
        out = call(x, *weight_args)
        return out[:B, :Tg]

    return forward


# ------------------------- parameter initialization --------------------------

def _kaiming_normal(key, shape):
    # torch.nn.init.kaiming_normal_ default: std = sqrt(2 / fan_in), fan_in = shape[1]
    std = (2.0 / shape[1]) ** 0.5
    return std * jax.random.normal(key, shape, jnp.float32)


def _xavier_normal(key, shape):
    # torch.nn.init.xavier_normal_ on a 3D tensor (L, B, H)
    fan_in = shape[1] * shape[2]
    fan_out = shape[0] * shape[2]
    std = (2.0 / (fan_in + fan_out)) ** 0.5
    return std * jax.random.normal(key, shape, jnp.float32)


def init_lstm_predict(key, input_size, hidden_size, num_layers, tag_size,
                      batch_size):
    params = {"layers": []}
    for layer in range(num_layers):
        in_sz = input_size if layer == 0 else hidden_size
        key, k1, k2, k3, k4 = jax.random.split(key, 5)
        w_ih = _kaiming_normal(k1, (4 * hidden_size, in_sz))
        w_hh = _kaiming_normal(k2, (4 * hidden_size, hidden_size))
        b_ih = jax.random.normal(k3, (4 * hidden_size,), jnp.float32)
        b_hh = jax.random.normal(k4, (4 * hidden_size,), jnp.float32)
        params["layers"].append({
            "w_ih_t": jnp.asarray(w_ih.T),
            "w_hh_t": jnp.asarray(w_hh.T),
            "b": (b_ih + b_hh).reshape(1, 4 * hidden_size),
        })
    # lstm2tag: PyTorch default Linear init (uniform in +-1/sqrt(fan_in))
    key, k1, k2, k3, k4 = jax.random.split(key, 5)
    bound = 1.0 / (hidden_size ** 0.5)
    w_tag = jax.random.uniform(k1, (tag_size, hidden_size), jnp.float32,
                               -bound, bound)
    b_tag = jax.random.uniform(k2, (tag_size,), jnp.float32, -bound, bound)
    params["w_tag_t"] = jnp.asarray(w_tag.T)
    params["b_tag"] = b_tag.reshape(1, tag_size)
    # init_hidden(): xavier_normal on (num_layers, batch, hidden)
    h0 = _xavier_normal(k3, (num_layers, batch_size, hidden_size))
    c0 = _xavier_normal(k4, (num_layers, batch_size, hidden_size))
    return params, h0, c0


# ---------------------------- pure-JAX reference -----------------------------

def reference_forward(params, h0, c0, orientations):
    x = orientations
    B, T, _ = x.shape
    H = h0.shape[-1]
    for idx, lp in enumerate(params["layers"]):
        h, c = h0[idx], c0[idx]
        outs = []
        for t in range(T):
            gates = x[:, t, :] @ lp["w_ih_t"] + h @ lp["w_hh_t"] + lp["b"]
            i = jax.nn.sigmoid(gates[:, 0 * H:1 * H])
            f = jax.nn.sigmoid(gates[:, 1 * H:2 * H])
            g = jnp.tanh(gates[:, 2 * H:3 * H])
            o = jax.nn.sigmoid(gates[:, 3 * H:4 * H])
            c = f * c + i * g
            h = o * jnp.tanh(c)
            outs.append(h)
        x = jnp.stack(outs, axis=1)
    return x[:, -1, :] @ params["w_tag_t"] + params["b_tag"]


# ------------------------------------ main ------------------------------------

if __name__ == "__main__":
    INPUT_SIZE = 8
    HIDDEN_SIZE = 32
    NUM_LAYERS = 2
    TAG_SIZE = 16          # small-shape stand-in for the default 144
    BATCH = 4
    SEQ = 8

    key = jax.random.PRNGKey(0)
    key, pkey, xkey = jax.random.split(key, 3)
    params, h0, c0 = init_lstm_predict(pkey, INPUT_SIZE, HIDDEN_SIZE,
                                       NUM_LAYERS, TAG_SIZE, BATCH)
    orientations = jax.random.normal(xkey, (BATCH, SEQ, INPUT_SIZE), jnp.float32)

    packed = pack_params(params, h0, c0)
    forward = build_forward(packed, SEQ)

    out = jax.block_until_ready(forward(orientations))
    assert out.shape == (BATCH, TAG_SIZE)

    ref = jax.block_until_ready(reference_forward(params, h0, c0, orientations))
    # bf16 MXU operands (f32 accumulate) -> loosened tolerance vs. f32 reference.
    assert jnp.allclose(out, ref, rtol=5e-2, atol=5e-2), \
        float(jnp.max(jnp.abs(out - ref)))

    print("KERNEL_OK")
</pallas_src>

<mosaic_0001>
module attributes {stable_mosaic.version = 11 : i64} {
  func.func @kernel(%arg0: i32, %arg1: memref<8x8x8xf32, #tpu.memory_space<vmem>>, %arg2: memref<8x128xbf16, #tpu.memory_space<vmem>>, %arg3: memref<32x128xbf16, #tpu.memory_space<vmem>>, %arg4: memref<1x128xf32, #tpu.memory_space<vmem>>, %arg5: memref<32x128xbf16, #tpu.memory_space<vmem>>, %arg6: memref<32x128xbf16, #tpu.memory_space<vmem>>, %arg7: memref<1x128xf32, #tpu.memory_space<vmem>>, %arg8: memref<2x8x32xf32, #tpu.memory_space<vmem>>, %arg9: memref<2x8x32xf32, #tpu.memory_space<vmem>>, %arg10: memref<32x128xbf16, #tpu.memory_space<vmem>>, %arg11: memref<1x128xf32, #tpu.memory_space<vmem>>, %arg12: memref<8x128xf32, #tpu.memory_space<vmem>>) attributes {dimension_semantics = [#tpu.dimension_semantics<parallel>], iteration_bounds = array<i64: 1>, scalar_prefetch = 0 : i64, scratch_operands = 0 : i64, tpu.core_type = #tpu.core_type<tc>, window_params = [{transform_indices = @transform_0, window_bounds = array<i64: 8, 8, 8>}, {pipeline_mode = #tpu.pipeline_mode<synchronous>, transform_indices = @transform_1, window_bounds = array<i64: 8, 128>}, {pipeline_mode = #tpu.pipeline_mode<synchronous>, transform_indices = @transform_2, window_bounds = array<i64: 32, 128>}, {pipeline_mode = #tpu.pipeline_mode<synchronous>, transform_indices = @transform_3, window_bounds = array<i64: 1, 128>}, {pipeline_mode = #tpu.pipeline_mode<synchronous>, transform_indices = @transform_4, window_bounds = array<i64: 32, 128>}, {pipeline_mode = #tpu.pipeline_mode<synchronous>, transform_indices = @transform_5, window_bounds = array<i64: 32, 128>}, {pipeline_mode = #tpu.pipeline_mode<synchronous>, transform_indices = @transform_6, window_bounds = array<i64: 1, 128>}, {transform_indices = @transform_7, window_bounds = array<i64: 2, 8, 32>}, {transform_indices = @transform_8, window_bounds = array<i64: 2, 8, 32>}, {pipeline_mode = #tpu.pipeline_mode<synchronous>, transform_indices = @transform_9, window_bounds = array<i64: 32, 128>}, {pipeline_mode = #tpu.pipeline_mode<synchronous>, transform_indices = @transform_10, window_bounds = array<i64: 1, 128>}, {transform_indices = @transform_11, window_bounds = array<i64: 8, 128>}]} {
    %c0 = arith.constant 0 : index
    %c0_0 = arith.constant 0 : index
    %0 = vector.load %arg2[%c0, %c0_0] : memref<8x128xbf16, #tpu.memory_space<vmem>>, vector<8x128xbf16>
    %c0_1 = arith.constant 0 : index
    %c0_2 = arith.constant 0 : index
    %1 = vector.load %arg5[%c0_1, %c0_2] : memref<32x128xbf16, #tpu.memory_space<vmem>>, vector<32x128xbf16>
    %c0_3 = arith.constant 0 : index
    %c0_4 = arith.constant 0 : index
    %2 = vector.load %arg3[%c0_3, %c0_4] : memref<32x128xbf16, #tpu.memory_space<vmem>>, vector<32x128xbf16>
    %c0_5 = arith.constant 0 : index
    %c0_6 = arith.constant 0 : index
    %3 = vector.load %arg6[%c0_5, %c0_6] : memref<32x128xbf16, #tpu.memory_space<vmem>>, vector<32x128xbf16>
    %c0_7 = arith.constant 0 : index
    %c0_8 = arith.constant 0 : index
    %4 = vector.load %arg4[%c0_7, %c0_8] : memref<1x128xf32, #tpu.memory_space<vmem>>, vector<1x128xf32>
    %5 = vector.shape_cast %4 : vector<1x128xf32> to vector<1x128xf32>
    %6 = vector.broadcast %5 : vector<1x128xf32> to vector<8x128xf32>
    %c0_9 = arith.constant 0 : index
    %c0_10 = arith.constant 0 : index
    %7 = vector.load %arg7[%c0_9, %c0_10] : memref<1x128xf32, #tpu.memory_space<vmem>>, vector<1x128xf32>
    %8 = vector.shape_cast %7 : vector<1x128xf32> to vector<1x128xf32>
    %9 = vector.broadcast %8 : vector<1x128xf32> to vector<8x128xf32>
    %c0_11 = arith.constant 0 : index
    %c0_12 = arith.constant 0 : index
    %c0_13 = arith.constant 0 : index
    %10 = vector.load %arg8[%c0_11, %c0_12, %c0_13] : memref<2x8x32xf32, #tpu.memory_space<vmem>>, vector<1x8x32xf32>
    %11 = vector.shape_cast %10 : vector<1x8x32xf32> to vector<8x32xf32>
    %c1 = arith.constant 1 : index
    %c0_14 = arith.constant 0 : index
    %c0_15 = arith.constant 0 : index
    %12 = vector.load %arg8[%c1, %c0_14, %c0_15] : memref<2x8x32xf32, #tpu.memory_space<vmem>>, vector<1x8x32xf32>
    %13 = vector.shape_cast %12 : vector<1x8x32xf32> to vector<8x32xf32>
    %c0_16 = arith.constant 0 : index
    %c0_17 = arith.constant 0 : index
    %c0_18 = arith.constant 0 : index
    %14 = vector.load %arg9[%c0_16, %c0_17, %c0_18] : memref<2x8x32xf32, #tpu.memory_space<vmem>>, vector<1x8x32xf32>
    %15 = vector.shape_cast %14 : vector<1x8x32xf32> to vector<8x32xf32>
    %c1_19 = arith.constant 1 : index
    %c0_20 = arith.constant 0 : index
    %c0_21 = arith.constant 0 : index
    %16 = vector.load %arg9[%c1_19, %c0_20, %c0_21] : memref<2x8x32xf32, #tpu.memory_space<vmem>>, vector<1x8x32xf32>
    %17 = vector.shape_cast %16 : vector<1x8x32xf32> to vector<8x32xf32>
    %c0_22 = arith.constant 0 : index
    %c0_23 = arith.constant 0 : index
    %c0_24 = arith.constant 0 : index
    %18 = vector.load %arg1[%c0_22, %c0_23, %c0_24] : memref<8x8x8xf32, #tpu.memory_space<vmem>>, vector<1x8x8xf32>
    %19 = vector.shape_cast %18 : vector<1x8x8xf32> to vector<8x8xf32>
    %20 = arith.truncf %19 : vector<8x8xf32> to vector<8x8xbf16>
    %cst = arith.constant dense<0.000000e+00> : vector<8x128xf32>
    %21 = tpu.matmul %20, %0, %cst {dimension_numbers = #tpu.dot_dimension_numbers<[1], [0], [0], [1], [0, 0, 1, 1], [], []>} : vector<8x8xbf16>, vector<8x128xbf16>, vector<8x128xf32> -> vector<8x128xf32>
    %22 = arith.truncf %11 : vector<8x32xf32> to vector<8x32xbf16>
    %cst_25 = arith.constant dense<0.000000e+00> : vector<8x128xf32>
    %23 = tpu.matmul %22, %2, %cst_25 {dimension_numbers = #tpu.dot_dimension_numbers<[1], [0], [0], [1], [0, 0, 1, 1], [], []>} : vector<8x32xbf16>, vector<32x128xbf16>, vector<8x128xf32> -> vector<8x128xf32>
    %24 = arith.addf %21, %23 : vector<8x128xf32>
    %25 = arith.addf %24, %6 : vector<8x128xf32>
    %26 = math.tanh %25 : vector<8x128xf32>
    %27 = vector.extract_strided_slice %26 {offsets = [0, 0], sizes = [8, 32], strides = [1, 1]} : vector<8x128xf32> to vector<8x32xf32>
    %cst_26 = arith.constant 5.000000e-01 : f32
    %28 = vector.broadcast %cst_26 : f32 to vector<8x32xf32>
    %29 = arith.mulf %28, %27 : vector<8x32xf32>
    %cst_27 = arith.constant 5.000000e-01 : f32
    %30 = vector.broadcast %cst_27 : f32 to vector<8x32xf32>
    %31 = arith.addf %29, %30 : vector<8x32xf32>
    %32 = vector.extract_strided_slice %26 {offsets = [0, 32], sizes = [8, 32], strides = [1, 1]} : vector<8x128xf32> to vector<8x32xf32>
    %cst_28 = arith.constant 5.000000e-01 : f32
    %33 = vector.broadcast %cst_28 : f32 to vector<8x32xf32>
    %34 = arith.mulf %33, %32 : vector<8x32xf32>
    %cst_29 = arith.constant 5.000000e-01 : f32
    %35 = vector.broadcast %cst_29 : f32 to vector<8x32xf32>
    %36 = arith.addf %34, %35 : vector<8x32xf32>
    %37 = vector.extract_strided_slice %26 {offsets = [0, 64], sizes = [8, 32], strides = [1, 1]} : vector<8x128xf32> to vector<8x32xf32>
    %38 = vector.extract_strided_slice %26 {offsets = [0, 96], sizes = [8, 32], strides = [1, 1]} : vector<8x128xf32> to vector<8x32xf32>
    %cst_30 = arith.constant 5.000000e-01 : f32
    %39 = vector.broadcast %cst_30 : f32 to vector<8x32xf32>
    %40 = arith.mulf %39, %38 : vector<8x32xf32>
    %cst_31 = arith.constant 5.000000e-01 : f32
    %41 = vector.broadcast %cst_31 : f32 to vector<8x32xf32>
    %42 = arith.addf %40, %41 : vector<8x32xf32>
    %43 = arith.mulf %36, %15 : vector<8x32xf32>
    %44 = arith.mulf %31, %37 : vector<8x32xf32>
    %45 = arith.addf %43, %44 : vector<8x32xf32>
    %46 = math.tanh %45 : vector<8x32xf32>
    %47 = arith.mulf %42, %46 : vector<8x32xf32>
    %c1_32 = arith.constant 1 : index
    %c0_33 = arith.constant 0 : index
    %c0_34 = arith.constant 0 : index
    %48 = vector.load %arg1[%c1_32, %c0_33, %c0_34] : memref<8x8x8xf32, #tpu.memory_space<vmem>>, vector<1x8x8xf32>
    %49 = vector.shape_cast %48 : vector<1x8x8xf32> to vector<8x8xf32>
    %50 = arith.truncf %49 : vector<8x8xf32> to vector<8x8xbf16>
    %cst_35 = arith.constant dense<0.000000e+00> : vector<8x128xf32>
    %51 = tpu.matmul %50, %0, %cst_35 {dimension_numbers = #tpu.dot_dimension_numbers<[1], [0], [0], [1], [0, 0, 1, 1], [], []>} : vector<8x8xbf16>, vector<8x128xbf16>, vector<8x128xf32> -> vector<8x128xf32>
    %52 = arith.truncf %47 : vector<8x32xf32> to vector<8x32xbf16>
    %cst_36 = arith.constant dense<0.000000e+00> : vector<8x128xf32>
    %53 = tpu.matmul %52, %2, %cst_36 {dimension_numbers = #tpu.dot_dimension_numbers<[1], [0], [0], [1], [0, 0, 1, 1], [], []>} : vector<8x32xbf16>, vector<32x128xbf16>, vector<8x128xf32> -> vector<8x128xf32>
    %54 = arith.addf %51, %53 : vector<8x128xf32>
    %55 = arith.addf %54, %6 : vector<8x128xf32>
    %56 = math.tanh %55 : vector<8x128xf32>
    %57 = vector.extract_strided_slice %56 {offsets = [0, 0], sizes = [8, 32], strides = [1, 1]} : vector<8x128xf32> to vector<8x32xf32>
    %cst_37 = arith.constant 5.000000e-01 : f32
    %58 = vector.broadcast %cst_37 : f32 to vector<8x32xf32>
    %59 = arith.mulf %58, %57 : vector<8x32xf32>
    %cst_38 = arith.constant 5.000000e-01 : f32
    %60 = vector.broadcast %cst_38 : f32 to vector<8x32xf32>
    %61 = arith.addf %59, %60 : vector<8x32xf32>
    %62 = vector.extract_strided_slice %56 {offsets = [0, 32], sizes = [8, 32], strides = [1, 1]} : vector<8x128xf32> to vector<8x32xf32>
    %cst_39 = arith.constant 5.000000e-01 : f32
    %63 = vector.broadcast %cst_39 : f32 to vector<8x32xf32>
    %64 = arith.mulf %63, %62 : vector<8x32xf32>
    %cst_40 = arith.constant 5.000000e-01 : f32
    %65 = vector.broadcast %cst_40 : f32 to vector<8x32xf32>
    %66 = arith.addf %64, %65 : vector<8x32xf32>
    %67 = vector.extract_strided_slice %56 {offsets = [0, 64], sizes = [8, 32], strides = [1, 1]} : vector<8x128xf32> to vector<8x32xf32>
    %68 = vector.extract_strided_slice %56 {offsets = [0, 96], sizes = [8, 32], strides = [1, 1]} : vector<8x128xf32> to vector<8x32xf32>
    %cst_41 = arith.constant 5.000000e-01 : f32
    %69 = vector.broadcast %cst_41 : f32 to vector<8x32xf32>
    %70 = arith.mulf %69, %68 : vector<8x32xf32>
    %cst_42 = arith.constant 5.000000e-01 : f32
    %71 = vector.broadcast %cst_42 : f32 to vector<8x32xf32>
    %72 = arith.addf %70, %71 : vector<8x32xf32>
    %73 = arith.mulf %66, %45 : vector<8x32xf32>
    %74 = arith.mulf %61, %67 : vector<8x32xf32>
    %75 = arith.addf %73, %74 : vector<8x32xf32>
    %76 = math.tanh %75 : vector<8x32xf32>
    %77 = arith.mulf %72, %76 : vector<8x32xf32>
    %78 = arith.truncf %47 : vector<8x32xf32> to vector<8x32xbf16>
    %cst_43 = arith.constant dense<0.000000e+00> : vector<8x128xf32>
    %79 = tpu.matmul %78, %1, %cst_43 {dimension_numbers = #tpu.dot_dimension_numbers<[1], [0], [0], [1], [0, 0, 1, 1], [], []>} : vector<8x32xbf16>, vector<32x128xbf16>, vector<8x128xf32> -> vector<8x128xf32>
    %80 = arith.truncf %13 : vector<8x32xf32> to vector<8x32xbf16>
    %cst_44 = arith.constant dense<0.000000e+00> : vector<8x128xf32>
    %81 = tpu.matmul %80, %3, %cst_44 {dimension_numbers = #tpu.dot_dimension_numbers<[1], [0], [0], [1], [0, 0, 1, 1], [], []>} : vector<8x32xbf16>, vector<32x128xbf16>, vector<8x128xf32> -> vector<8x128xf32>
    %82 = arith.addf %79, %81 : vector<8x128xf32>
    %83 = arith.addf %82, %9 : vector<8x128xf32>
    %84 = math.tanh %83 : vector<8x128xf32>
    %85 = vector.extract_strided_slice %84 {offsets = [0, 0], sizes = [8, 32], strides = [1, 1]} : vector<8x128xf32> to vector<8x32xf32>
    %cst_45 = arith.constant 5.000000e-01 : f32
    %86 = vector.broadcast %cst_45 : f32 to vector<8x32xf32>
    %87 = arith.mulf %86, %85 : vector<8x32xf32>
    %cst_46 = arith.constant 5.000000e-01 : f32
    %88 = vector.broadcast %cst_46 : f32 to vector<8x32xf32>
    %89 = arith.addf %87, %88 : vector<8x32xf32>
    %90 = vector.extract_strided_slice %84 {offsets = [0, 32], sizes = [8, 32], strides = [1, 1]} : vector<8x128xf32> to vector<8x32xf32>
    %cst_47 = arith.constant 5.000000e-01 : f32
    %91 = vector.broadcast %cst_47 : f32 to vector<8x32xf32>
    %92 = arith.mulf %91, %90 : vector<8x32xf32>
    %cst_48 = arith.constant 5.000000e-01 : f32
    %93 = vector.broadcast %cst_48 : f32 to vector<8x32xf32>
    %94 = arith.addf %92, %93 : vector<8x32xf32>
    %95 = vector.extract_strided_slice %84 {offsets = [0, 64], sizes = [8, 32], strides = [1, 1]} : vector<8x128xf32> to vector<8x32xf32>
    %96 = vector.extract_strided_slice %84 {offsets = [0, 96], sizes = [8, 32], strides = [1, 1]} : vector<8x128xf32> to vector<8x32xf32>
    %cst_49 = arith.constant 5.000000e-01 : f32
    %97 = vector.broadcast %cst_49 : f32 to vector<8x32xf32>
    %98 = arith.mulf %97, %96 : vector<8x32xf32>
    %cst_50 = arith.constant 5.000000e-01 : f32
    %99 = vector.broadcast %cst_50 : f32 to vector<8x32xf32>
    %100 = arith.addf %98, %99 : vector<8x32xf32>
    %101 = arith.mulf %94, %17 : vector<8x32xf32>
    %102 = arith.mulf %89, %95 : vector<8x32xf32>
    %103 = arith.addf %101, %102 : vector<8x32xf32>
    %104 = math.tanh %103 : vector<8x32xf32>
    %105 = arith.mulf %100, %104 : vector<8x32xf32>
    %c2 = arith.constant 2 : index
    %c0_51 = arith.constant 0 : index
    %c0_52 = arith.constant 0 : index
    %106 = vector.load %arg1[%c2, %c0_51, %c0_52] : memref<8x8x8xf32, #tpu.memory_space<vmem>>, vector<1x8x8xf32>
    %107 = vector.shape_cast %106 : vector<1x8x8xf32> to vector<8x8xf32>
    %108 = arith.truncf %107 : vector<8x8xf32> to vector<8x8xbf16>
    %cst_53 = arith.constant dense<0.000000e+00> : vector<8x128xf32>
    %109 = tpu.matmul %108, %0, %cst_53 {dimension_numbers = #tpu.dot_dimension_numbers<[1], [0], [0], [1], [0, 0, 1, 1], [], []>} : vector<8x8xbf16>, vector<8x128xbf16>, vector<8x128xf32> -> vector<8x128xf32>
    %110 = arith.truncf %77 : vector<8x32xf32> to vector<8x32xbf16>
    %cst_54 = arith.constant dense<0.000000e+00> : vector<8x128xf32>
    %111 = tpu.matmul %110, %2, %cst_54 {dimension_numbers = #tpu.dot_dimension_numbers<[1], [0], [0], [1], [0, 0, 1, 1], [], []>} : vector<8x32xbf16>, vector<32x128xbf16>, vector<8x128xf32> -> vector<8x128xf32>
    %112 = arith.addf %109, %111 : vector<8x128xf32>
    %113 = arith.addf %112, %6 : vector<8x128xf32>
    %114 = math.tanh %113 : vector<8x128xf32>
    %115 = vector.extract_strided_slice %114 {offsets = [0, 0], sizes = [8, 32], strides = [1, 1]} : vector<8x128xf32> to vector<8x32xf32>
    %cst_55 = arith.constant 5.000000e-01 : f32
    %116 = vector.broadcast %cst_55 : f32 to vector<8x32xf32>
    %117 = arith.mulf %116, %115 : vector<8x32xf32>
    %cst_56 = arith.constant 5.000000e-01 : f32
    %118 = vector.broadcast %cst_56 : f32 to vector<8x32xf32>
    %119 = arith.addf %117, %118 : vector<8x32xf32>
    %120 = vector.extract_strided_slice %114 {offsets = [0, 32], sizes = [8, 32], strides = [1, 1]} : vector<8x128xf32> to vector<8x32xf32>
    %cst_57 = arith.constant 5.000000e-01 : f32
    %121 = vector.broadcast %cst_57 : f32 to vector<8x32xf32>
    %122 = arith.mulf %121, %120 : vector<8x32xf32>
    %cst_58 = arith.constant 5.000000e-01 : f32
    %123 = vector.broadcast %cst_58 : f32 to vector<8x32xf32>
    %124 = arith.addf %122, %123 : vector<8x32xf32>
    %125 = vector.extract_strided_slice %114 {offsets = [0, 64], sizes = [8, 32], strides = [1, 1]} : vector<8x128xf32> to vector<8x32xf32>
    %126 = vector.extract_strided_slice %114 {offsets = [0, 96], sizes = [8, 32], strides = [1, 1]} : vector<8x128xf32> to vector<8x32xf32>
    %cst_59 = arith.constant 5.000000e-01 : f32
    %127 = vector.broadcast %cst_59 : f32 to vector<8x32xf32>
    %128 = arith.mulf %127, %126 : vector<8x32xf32>
    %cst_60 = arith.constant 5.000000e-01 : f32
    %129 = vector.broadcast %cst_60 : f32 to vector<8x32xf32>
    %130 = arith.addf %128, %129 : vector<8x32xf32>
    %131 = arith.mulf %124, %75 : vector<8x32xf32>
    %132 = arith.mulf %119, %125 : vector<8x32xf32>
    %133 = arith.addf %131, %132 : vector<8x32xf32>
    %134 = math.tanh %133 : vector<8x32xf32>
    %135 = arith.mulf %130, %134 : vector<8x32xf32>
    %136 = arith.truncf %77 : vector<8x32xf32> to vector<8x32xbf16>
    %cst_61 = arith.constant dense<0.000000e+00> : vector<8x128xf32>
    %137 = tpu.matmul %136, %1, %cst_61 {dimension_numbers = #tpu.dot_dimension_numbers<[1], [0], [0], [1], [0, 0, 1, 1], [], []>} : vector<8x32xbf16>, vector<32x128xbf16>, vector<8x128xf32> -> vector<8x128xf32>
    %138 = arith.truncf %105 : vector<8x32xf32> to vector<8x32xbf16>
    %cst_62 = arith.constant dense<0.000000e+00> : vector<8x128xf32>
    %139 = tpu.matmul %138, %3, %cst_62 {dimension_numbers = #tpu.dot_dimension_numbers<[1], [0], [0], [1], [0, 0, 1, 1], [], []>} : vector<8x32xbf16>, vector<32x128xbf16>, vector<8x128xf32> -> vector<8x128xf32>
    %140 = arith.addf %137, %139 : vector<8x128xf32>
    %141 = arith.addf %140, %9 : vector<8x128xf32>
    %142 = math.tanh %141 : vector<8x128xf32>
    %143 = vector.extract_strided_slice %142 {offsets = [0, 0], sizes = [8, 32], strides = [1, 1]} : vector<8x128xf32> to vector<8x32xf32>
    %cst_63 = arith.constant 5.000000e-01 : f32
    %144 = vector.broadcast %cst_63 : f32 to vector<8x32xf32>
    %145 = arith.mulf %144, %143 : vector<8x32xf32>
    %cst_64 = arith.constant 5.000000e-01 : f32
    %146 = vector.broadcast %cst_64 : f32 to vector<8x32xf32>
    %147 = arith.addf %145, %146 : vector<8x32xf32>
    %148 = vector.extract_strided_slice %142 {offsets = [0, 32], sizes = [8, 32], strides = [1, 1]} : vector<8x128xf32> to vector<8x32xf32>
    %cst_65 = arith.constant 5.000000e-01 : f32
    %149 = vector.broadcast %cst_65 : f32 to vector<8x32xf32>
    %150 = arith.mulf %149, %148 : vector<8x32xf32>
    %cst_66 = arith.constant 5.000000e-01 : f32
    %151 = vector.broadcast %cst_66 : f32 to vector<8x32xf32>
    %152 = arith.addf %150, %151 : vector<8x32xf32>
    %153 = vector.extract_strided_slice %142 {offsets = [0, 64], sizes = [8, 32], strides = [1, 1]} : vector<8x128xf32> to vector<8x32xf32>
    %154 = vector.extract_strided_slice %142 {offsets = [0, 96], sizes = [8, 32], strides = [1, 1]} : vector<8x128xf32> to vector<8x32xf32>
    %cst_67 = arith.constant 5.000000e-01 : f32
    %155 = vector.broadcast %cst_67 : f32 to vector<8x32xf32>
    %156 = arith.mulf %155, %154 : vector<8x32xf32>
    %cst_68 = arith.constant 5.000000e-01 : f32
    %157 = vector.broadcast %cst_68 : f32 to vector<8x32xf32>
    %158 = arith.addf %156, %157 : vector<8x32xf32>
    %159 = arith.mulf %152, %103 : vector<8x32xf32>
    %160 = arith.mulf %147, %153 : vector<8x32xf32>
    %161 = arith.addf %159, %160 : vector<8x32xf32>
    %162 = math.tanh %161 : vector<8x32xf32>
    %163 = arith.mulf %158, %162 : vector<8x32xf32>
    %c3 = arith.constant 3 : index
    %c0_69 = arith.constant 0 : index
    %c0_70 = arith.constant 0 : index
    %164 = vector.load %arg1[%c3, %c0_69, %c0_70] : memref<8x8x8xf32, #tpu.memory_space<vmem>>, vector<1x8x8xf32>
    %165 = vector.shape_cast %164 : vector<1x8x8xf32> to vector<8x8xf32>
    %166 = arith.truncf %165 : vector<8x8xf32> to vector<8x8xbf16>
    %cst_71 = arith.constant dense<0.000000e+00> : vector<8x128xf32>
    %167 = tpu.matmul %166, %0, %cst_71 {dimension_numbers = #tpu.dot_dimension_numbers<[1], [0], [0], [1], [0, 0, 1, 1], [], []>} : vector<8x8xbf16>, vector<8x128xbf16>, vector<8x128xf32> -> vector<8x128xf32>
    %168 = arith.truncf %135 : vector<8x32xf32> to vector<8x32xbf16>
    %cst_72 = arith.constant dense<0.000000e+00> : vector<8x128xf32>
    %169 = tpu.matmul %168, %2, %cst_72 {dimension_numbers = #tpu.dot_dimension_numbers<[1], [0], [0], [1], [0, 0, 1, 1], [], []>} : vector<8x32xbf16>, vector<32x128xbf16>, vector<8x128xf32> -> vector<8x128xf32>
    %170 = arith.addf %167, %169 : vector<8x128xf32>
    %171 = arith.addf %170, %6 : vector<8x128xf32>
    %172 = math.tanh %171 : vector<8x128xf32>
    %173 = vector.extract_strided_slice %172 {offsets = [0, 0], sizes = [8, 32], strides = [1, 1]} : vector<8x128xf32> to vector<8x32xf32>
    %cst_73 = arith.constant 5.000000e-01 : f32
    %174 = vector.broadcast %cst_73 : f32 to vector<8x32xf32>
    %175 = arith.mulf %174, %173 : vector<8x32xf32>
    %cst_74 = arith.constant 5.000000e-01 : f32
    %176 = vector.broadcast %cst_74 : f32 to vector<8x32xf32>
    %177 = arith.addf %175, %176 : vector<8x32xf32>
    %178 = vector.extract_strided_slice %172 {offsets = [0, 32], sizes = [8, 32], strides = [1, 1]} : vector<8x128xf32> to vector<8x32xf32>
    %cst_75 = arith.constant 5.000000e-01 : f32
    %179 = vector.broadcast %cst_75 : f32 to vector<8x32xf32>
    %180 = arith.mulf %179, %178 : vector<8x32xf32>
    %cst_76 = arith.constant 5.000000e-01 : f32
    %181 = vector.broadcast %cst_76 : f32 to vector<8x32xf32>
    %182 = arith.addf %180, %181 : vector<8x32xf32>
    %183 = vector.extract_strided_slice %172 {offsets = [0, 64], sizes = [8, 32], strides = [1, 1]} : vector<8x128xf32> to vector<8x32xf32>
    %184 = vector.extract_strided_slice %172 {offsets = [0, 96], sizes = [8, 32], strides = [1, 1]} : vector<8x128xf32> to vector<8x32xf32>
    %cst_77 = arith.constant 5.000000e-01 : f32
    %185 = vector.broadcast %cst_77 : f32 to vector<8x32xf32>
    %186 = arith.mulf %185, %184 : vector<8x32xf32>
    %cst_78 = arith.constant 5.000000e-01 : f32
    %187 = vector.broadcast %cst_78 : f32 to vector<8x32xf32>
    %188 = arith.addf %186, %187 : vector<8x32xf32>
    %189 = arith.mulf %182, %133 : vector<8x32xf32>
    %190 = arith.mulf %177, %183 : vector<8x32xf32>
    %191 = arith.addf %189, %190 : vector<8x32xf32>
    %192 = math.tanh %191 : vector<8x32xf32>
    %193 = arith.mulf %188, %192 : vector<8x32xf32>
    %194 = arith.truncf %135 : vector<8x32xf32> to vector<8x32xbf16>
    %cst_79 = arith.constant dense<0.000000e+00> : vector<8x128xf32>
    %195 = tpu.matmul %194, %1, %cst_79 {dimension_numbers = #tpu.dot_dimension_numbers<[1], [0], [0], [1], [0, 0, 1, 1], [], []>} : vector<8x32xbf16>, vector<32x128xbf16>, vector<8x128xf32> -> vector<8x128xf32>
    %196 = arith.truncf %163 : vector<8x32xf32> to vector<8x32xbf16>
    %cst_80 = arith.constant dense<0.000000e+00> : vector<8x128xf32>
    %197 = tpu.matmul %196, %3, %cst_80 {dimension_numbers = #tpu.dot_dimension_numbers<[1], [0], [0], [1], [0, 0, 1, 1], [], []>} : vector<8x32xbf16>, vector<32x128xbf16>, vector<8x128xf32> -> vector<8x128xf32>
    %198 = arith.addf %195, %197 : vector<8x128xf32>
    %199 = arith.addf %198, %9 : vector<8x128xf32>
    %200 = math.tanh %199 : vector<8x128xf32>
    %201 = vector.extract_strided_slice %200 {offsets = [0, 0], sizes = [8, 32], strides = [1, 1]} : vector<8x128xf32> to vector<8x32xf32>
    %cst_81 = arith.constant 5.000000e-01 : f32
    %202 = vector.broadcast %cst_81 : f32 to vector<8x32xf32>
    %203 = arith.mulf %202, %201 : vector<8x32xf32>
    %cst_82 = arith.constant 5.000000e-01 : f32
    %204 = vector.broadcast %cst_82 : f32 to vector<8x32xf32>
    %205 = arith.addf %203, %204 : vector<8x32xf32>
    %206 = vector.extract_strided_slice %200 {offsets = [0, 32], sizes = [8, 32], strides = [1, 1]} : vector<8x128xf32> to vector<8x32xf32>
    %cst_83 = arith.constant 5.000000e-01 : f32
    %207 = vector.broadcast %cst_83 : f32 to vector<8x32xf32>
    %208 = arith.mulf %207, %206 : vector<8x32xf32>
    %cst_84 = arith.constant 5.000000e-01 : f32
    %209 = vector.broadcast %cst_84 : f32 to vector<8x32xf32>
    %210 = arith.addf %208, %209 : vector<8x32xf32>
    %211 = vector.extract_strided_slice %200 {offsets = [0, 64], sizes = [8, 32], strides = [1, 1]} : vector<8x128xf32> to vector<8x32xf32>
    %212 = vector.extract_strided_slice %200 {offsets = [0, 96], sizes = [8, 32], strides = [1, 1]} : vector<8x128xf32> to vector<8x32xf32>
    %cst_85 = arith.constant 5.000000e-01 : f32
    %213 = vector.broadcast %cst_85 : f32 to vector<8x32xf32>
    %214 = arith.mulf %213, %212 : vector<8x32xf32>
    %cst_86 = arith.constant 5.000000e-01 : f32
    %215 = vector.broadcast %cst_86 : f32 to vector<8x32xf32>
    %216 = arith.addf %214, %215 : vector<8x32xf32>
    %217 = arith.mulf %210, %161 : vector<8x32xf32>
    %218 = arith.mulf %205, %211 : vector<8x32xf32>
    %219 = arith.addf %217, %218 : vector<8x32xf32>
    %220 = math.tanh %219 : vector<8x32xf32>
    %221 = arith.mulf %216, %220 : vector<8x32xf32>
    %c4 = arith.constant 4 : index
    %c0_87 = arith.constant 0 : index
    %c0_88 = arith.constant 0 : index
    %222 = vector.load %arg1[%c4, %c0_87, %c0_88] : memref<8x8x8xf32, #tpu.memory_space<vmem>>, vector<1x8x8xf32>
    %223 = vector.shape_cast %222 : vector<1x8x8xf32> to vector<8x8xf32>
    %224 = arith.truncf %223 : vector<8x8xf32> to vector<8x8xbf16>
    %cst_89 = arith.constant dense<0.000000e+00> : vector<8x128xf32>
    %225 = tpu.matmul %224, %0, %cst_89 {dimension_numbers = #tpu.dot_dimension_numbers<[1], [0], [0], [1], [0, 0, 1, 1], [], []>} : vector<8x8xbf16>, vector<8x128xbf16>, vector<8x128xf32> -> vector<8x128xf32>
    %226 = arith.truncf %193 : vector<8x32xf32> to vector<8x32xbf16>
    %cst_90 = arith.constant dense<0.000000e+00> : vector<8x128xf32>
    %227 = tpu.matmul %226, %2, %cst_90 {dimension_numbers = #tpu.dot_dimension_numbers<[1], [0], [0], [1], [0, 0, 1, 1], [], []>} : vector<8x32xbf16>, vector<32x128xbf16>, vector<8x128xf32> -> vector<8x128xf32>
    %228 = arith.addf %225, %227 : vector<8x128xf32>
    %229 = arith.addf %228, %6 : vector<8x128xf32>
    %230 = math.tanh %229 : vector<8x128xf32>
    %231 = vector.extract_strided_slice %230 {offsets = [0, 0], sizes = [8, 32], strides = [1, 1]} : vector<8x128xf32> to vector<8x32xf32>
    %cst_91 = arith.constant 5.000000e-01 : f32
    %232 = vector.broadcast %cst_91 : f32 to vector<8x32xf32>
    %233 = arith.mulf %232, %231 : vector<8x32xf32>
    %cst_92 = arith.constant 5.000000e-01 : f32
    %234 = vector.broadcast %cst_92 : f32 to vector<8x32xf32>
    %235 = arith.addf %233, %234 : vector<8x32xf32>
    %236 = vector.extract_strided_slice %230 {offsets = [0, 32], sizes = [8, 32], strides = [1, 1]} : vector<8x128xf32> to vector<8x32xf32>
    %cst_93 = arith.constant 5.000000e-01 : f32
    %237 = vector.broadcast %cst_93 : f32 to vector<8x32xf32>
    %238 = arith.mulf %237, %236 : vector<8x32xf32>
    %cst_94 = arith.constant 5.000000e-01 : f32
    %239 = vector.broadcast %cst_94 : f32 to vector<8x32xf32>
    %240 = arith.addf %238, %239 : vector<8x32xf32>
    %241 = vector.extract_strided_slice %230 {offsets = [0, 64], sizes = [8, 32], strides = [1, 1]} : vector<8x128xf32> to vector<8x32xf32>
    %242 = vector.extract_strided_slice %230 {offsets = [0, 96], sizes = [8, 32], strides = [1, 1]} : vector<8x128xf32> to vector<8x32xf32>
    %cst_95 = arith.constant 5.000000e-01 : f32
    %243 = vector.broadcast %cst_95 : f32 to vector<8x32xf32>
    %244 = arith.mulf %243, %242 : vector<8x32xf32>
    %cst_96 = arith.constant 5.000000e-01 : f32
    %245 = vector.broadcast %cst_96 : f32 to vector<8x32xf32>
    %246 = arith.addf %244, %245 : vector<8x32xf32>
    %247 = arith.mulf %240, %191 : vector<8x32xf32>
    %248 = arith.mulf %235, %241 : vector<8x32xf32>
    %249 = arith.addf %247, %248 : vector<8x32xf32>
    %250 = math.tanh %249 : vector<8x32xf32>
    %251 = arith.mulf %246, %250 : vector<8x32xf32>
    %252 = arith.truncf %193 : vector<8x32xf32> to vector<8x32xbf16>
    %cst_97 = arith.constant dense<0.000000e+00> : vector<8x128xf32>
    %253 = tpu.matmul %252, %1, %cst_97 {dimension_numbers = #tpu.dot_dimension_numbers<[1], [0], [0], [1], [0, 0, 1, 1], [], []>} : vector<8x32xbf16>, vector<32x128xbf16>, vector<8x128xf32> -> vector<8x128xf32>
    %254 = arith.truncf %221 : vector<8x32xf32> to vector<8x32xbf16>
    %cst_98 = arith.constant dense<0.000000e+00> : vector<8x128xf32>
    %255 = tpu.matmul %254, %3, %cst_98 {dimension_numbers = #tpu.dot_dimension_numbers<[1], [0], [0], [1], [0, 0, 1, 1], [], []>} : vector<8x32xbf16>, vector<32x128xbf16>, vector<8x128xf32> -> vector<8x128xf32>
    %256 = arith.addf %253, %255 : vector<8x128xf32>
    %257 = arith.addf %256, %9 : vector<8x128xf32>
    %258 = math.tanh %257 : vector<8x128xf32>
    %259 = vector.extract_strided_slice %258 {offsets = [0, 0], sizes = [8, 32], strides = [1, 1]} : vector<8x128xf32> to vector<8x32xf32>
    %cst_99 = arith.constant 5.000000e-01 : f32
    %260 = vector.broadcast %cst_99 : f32 to vector<8x32xf32>
    %261 = arith.mulf %260, %259 : vector<8x32xf32>
    %cst_100 = arith.constant 5.000000e-01 : f32
    %262 = vector.broadcast %cst_100 : f32 to vector<8x32xf32>
    %263 = arith.addf %261, %262 : vector<8x32xf32>
    %264 = vector.extract_strided_slice %258 {offsets = [0, 32], sizes = [8, 32], strides = [1, 1]} : vector<8x128xf32> to vector<8x32xf32>
    %cst_101 = arith.constant 5.000000e-01 : f32
    %265 = vector.broadcast %cst_101 : f32 to vector<8x32xf32>
    %266 = arith.mulf %265, %264 : vector<8x32xf32>
    %cst_102 = arith.constant 5.000000e-01 : f32
    %267 = vector.broadcast %cst_102 : f32 to vector<8x32xf32>
    %268 = arith.addf %266, %267 : vector<8x32xf32>
    %269 = vector.extract_strided_slice %258 {offsets = [0, 64], sizes = [8, 32], strides = [1, 1]} : vector<8x128xf32> to vector<8x32xf32>
    %270 = vector.extract_strided_slice %258 {offsets = [0, 96], sizes = [8, 32], strides = [1, 1]} : vector<8x128xf32> to vector<8x32xf32>
    %cst_103 = arith.constant 5.000000e-01 : f32
    %271 = vector.broadcast %cst_103 : f32 to vector<8x32xf32>
    %272 = arith.mulf %271, %270 : vector<8x32xf32>
    %cst_104 = arith.constant 5.000000e-01 : f32
    %273 = vector.broadcast %cst_104 : f32 to vector<8x32xf32>
    %274 = arith.addf %272, %273 : vector<8x32xf32>
    %275 = arith.mulf %268, %219 : vector<8x32xf32>
    %276 = arith.mulf %263, %269 : vector<8x32xf32>
    %277 = arith.addf %275, %276 : vector<8x32xf32>
    %278 = math.tanh %277 : vector<8x32xf32>
    %279 = arith.mulf %274, %278 : vector<8x32xf32>
    %c5 = arith.constant 5 : index
    %c0_105 = arith.constant 0 : index
    %c0_106 = arith.constant 0 : index
    %280 = vector.load %arg1[%c5, %c0_105, %c0_106] : memref<8x8x8xf32, #tpu.memory_space<vmem>>, vector<1x8x8xf32>
    %281 = vector.shape_cast %280 : vector<1x8x8xf32> to vector<8x8xf32>
    %282 = arith.truncf %281 : vector<8x8xf32> to vector<8x8xbf16>
    %cst_107 = arith.constant dense<0.000000e+00> : vector<8x128xf32>
    %283 = tpu.matmul %282, %0, %cst_107 {dimension_numbers = #tpu.dot_dimension_numbers<[1], [0], [0], [1], [0, 0, 1, 1], [], []>} : vector<8x8xbf16>, vector<8x128xbf16>, vector<8x128xf32> -> vector<8x128xf32>
    %284 = arith.truncf %251 : vector<8x32xf32> to vector<8x32xbf16>
    %cst_108 = arith.constant dense<0.000000e+00> : vector<8x128xf32>
    %285 = tpu.matmul %284, %2, %cst_108 {dimension_numbers = #tpu.dot_dimension_numbers<[1], [0], [0], [1], [0, 0, 1, 1], [], []>} : vector<8x32xbf16>, vector<32x128xbf16>, vector<8x128xf32> -> vector<8x128xf32>
    %286 = arith.addf %283, %285 : vector<8x128xf32>
    %287 = arith.addf %286, %6 : vector<8x128xf32>
    %288 = math.tanh %287 : vector<8x128xf32>
    %289 = vector.extract_strided_slice %288 {offsets = [0, 0], sizes = [8, 32], strides = [1, 1]} : vector<8x128xf32> to vector<8x32xf32>
    %cst_109 = arith.constant 5.000000e-01 : f32
    %290 = vector.broadcast %cst_109 : f32 to vector<8x32xf32>
    %291 = arith.mulf %290, %289 : vector<8x32xf32>
    %cst_110 = arith.constant 5.000000e-01 : f32
    %292 = vector.broadcast %cst_110 : f32 to vector<8x32xf32>
    %293 = arith.addf %291, %292 : vector<8x32xf32>
    %294 = vector.extract_strided_slice %288 {offsets = [0, 32], sizes = [8, 32], strides = [1, 1]} : vector<8x128xf32> to vector<8x32xf32>
    %cst_111 = arith.constant 5.000000e-01 : f32
    %295 = vector.broadcast %cst_111 : f32 to vector<8x32xf32>
    %296 = arith.mulf %295, %294 : vector<8x32xf32>
    %cst_112 = arith.constant 5.000000e-01 : f32
    %297 = vector.broadcast %cst_112 : f32 to vector<8x32xf32>
    %298 = arith.addf %296, %297 : vector<8x32xf32>
    %299 = vector.extract_strided_slice %288 {offsets = [0, 64], sizes = [8, 32], strides = [1, 1]} : vector<8x128xf32> to vector<8x32xf32>
    %300 = vector.extract_strided_slice %288 {offsets = [0, 96], sizes = [8, 32], strides = [1, 1]} : vector<8x128xf32> to vector<8x32xf32>
    %cst_113 = arith.constant 5.000000e-01 : f32
    %301 = vector.broadcast %cst_113 : f32 to vector<8x32xf32>
    %302 = arith.mulf %301, %300 : vector<8x32xf32>
    %cst_114 = arith.constant 5.000000e-01 : f32
    %303 = vector.broadcast %cst_114 : f32 to vector<8x32xf32>
    %304 = arith.addf %302, %303 : vector<8x32xf32>
    %305 = arith.mulf %298, %249 : vector<8x32xf32>
    %306 = arith.mulf %293, %299 : vector<8x32xf32>
    %307 = arith.addf %305, %306 : vector<8x32xf32>
    %308 = math.tanh %307 : vector<8x32xf32>
    %309 = arith.mulf %304, %308 : vector<8x32xf32>
    %310 = arith.truncf %251 : vector<8x32xf32> to vector<8x32xbf16>
    %cst_115 = arith.constant dense<0.000000e+00> : vector<8x128xf32>
    %311 = tpu.matmul %310, %1, %cst_115 {dimension_numbers = #tpu.dot_dimension_numbers<[1], [0], [0], [1], [0, 0, 1, 1], [], []>} : vector<8x32xbf16>, vector<32x128xbf16>, vector<8x128xf32> -> vector<8x128xf32>
    %312 = arith.truncf %279 : vector<8x32xf32> to vector<8x32xbf16>
    %cst_116 = arith.constant dense<0.000000e+00> : vector<8x128xf32>
    %313 = tpu.matmul %312, %3, %cst_116 {dimension_numbers = #tpu.dot_dimension_numbers<[1], [0], [0], [1], [0, 0, 1, 1], [], []>} : vector<8x32xbf16>, vector<32x128xbf16>, vector<8x128xf32> -> vector<8x128xf32>
    %314 = arith.addf %311, %313 : vector<8x128xf32>
    %315 = arith.addf %314, %9 : vector<8x128xf32>
    %316 = math.tanh %315 : vector<8x128xf32>
    %317 = vector.extract_strided_slice %316 {offsets = [0, 0], sizes = [8, 32], strides = [1, 1]} : vector<8x128xf32> to vector<8x32xf32>
    %cst_117 = arith.constant 5.000000e-01 : f32
    %318 = vector.broadcast %cst_117 : f32 to vector<8x32xf32>
    %319 = arith.mulf %318, %317 : vector<8x32xf32>
    %cst_118 = arith.constant 5.000000e-01 : f32
    %320 = vector.broadcast %cst_118 : f32 to vector<8x32xf32>
    %321 = arith.addf %319, %320 : vector<8x32xf32>
    %322 = vector.extract_strided_slice %316 {offsets = [0, 32], sizes = [8, 32], strides = [1, 1]} : vector<8x128xf32> to vector<8x32xf32>
    %cst_119 = arith.constant 5.000000e-01 : f32
    %323 = vector.broadcast %cst_119 : f32 to vector<8x32xf32>
    %324 = arith.mulf %323, %322 : vector<8x32xf32>
    %cst_120 = arith.constant 5.000000e-01 : f32
    %325 = vector.broadcast %cst_120 : f32 to vector<8x32xf32>
    %326 = arith.addf %324, %325 : vector<8x32xf32>
    %327 = vector.extract_strided_slice %316 {offsets = [0, 64], sizes = [8, 32], strides = [1, 1]} : vector<8x128xf32> to vector<8x32xf32>
    %328 = vector.extract_strided_slice %316 {offsets = [0, 96], sizes = [8, 32], strides = [1, 1]} : vector<8x128xf32> to vector<8x32xf32>
    %cst_121 = arith.constant 5.000000e-01 : f32
    %329 = vector.broadcast %cst_121 : f32 to vector<8x32xf32>
    %330 = arith.mulf %329, %328 : vector<8x32xf32>
    %cst_122 = arith.constant 5.000000e-01 : f32
    %331 = vector.broadcast %cst_122 : f32 to vector<8x32xf32>
    %332 = arith.addf %330, %331 : vector<8x32xf32>
    %333 = arith.mulf %326, %277 : vector<8x32xf32>
    %334 = arith.mulf %321, %327 : vector<8x32xf32>
    %335 = arith.addf %333, %334 : vector<8x32xf32>
    %336 = math.tanh %335 : vector<8x32xf32>
    %337 = arith.mulf %332, %336 : vector<8x32xf32>
    %c6 = arith.constant 6 : index
    %c0_123 = arith.constant 0 : index
    %c0_124 = arith.constant 0 : index
    %338 = vector.load %arg1[%c6, %c0_123, %c0_124] : memref<8x8x8xf32, #tpu.memory_space<vmem>>, vector<1x8x8xf32>
    %339 = vector.shape_cast %338 : vector<1x8x8xf32> to vector<8x8xf32>
    %340 = arith.truncf %339 : vector<8x8xf32> to vector<8x8xbf16>
    %cst_125 = arith.constant dense<0.000000e+00> : vector<8x128xf32>
    %341 = tpu.matmul %340, %0, %cst_125 {dimension_numbers = #tpu.dot_dimension_numbers<[1], [0], [0], [1], [0, 0, 1, 1], [], []>} : vector<8x8xbf16>, vector<8x128xbf16>, vector<8x128xf32> -> vector<8x128xf32>
    %342 = arith.truncf %309 : vector<8x32xf32> to vector<8x32xbf16>
    %cst_126 = arith.constant dense<0.000000e+00> : vector<8x128xf32>
    %343 = tpu.matmul %342, %2, %cst_126 {dimension_numbers = #tpu.dot_dimension_numbers<[1], [0], [0], [1], [0, 0, 1, 1], [], []>} : vector<8x32xbf16>, vector<32x128xbf16>, vector<8x128xf32> -> vector<8x128xf32>
    %344 = arith.addf %341, %343 : vector<8x128xf32>
    %345 = arith.addf %344, %6 : vector<8x128xf32>
    %346 = math.tanh %345 : vector<8x128xf32>
    %347 = vector.extract_strided_slice %346 {offsets = [0, 0], sizes = [8, 32], strides = [1, 1]} : vector<8x128xf32> to vector<8x32xf32>
    %cst_127 = arith.constant 5.000000e-01 : f32
    %348 = vector.broadcast %cst_127 : f32 to vector<8x32xf32>
    %349 = arith.mulf %348, %347 : vector<8x32xf32>
    %cst_128 = arith.constant 5.000000e-01 : f32
    %350 = vector.broadcast %cst_128 : f32 to vector<8x32xf32>
    %351 = arith.addf %349, %350 : vector<8x32xf32>
    %352 = vector.extract_strided_slice %346 {offsets = [0, 32], sizes = [8, 32], strides = [1, 1]} : vector<8x128xf32> to vector<8x32xf32>
    %cst_129 = arith.constant 5.000000e-01 : f32
    %353 = vector.broadcast %cst_129 : f32 to vector<8x32xf32>
    %354 = arith.mulf %353, %352 : vector<8x32xf32>
    %cst_130 = arith.constant 5.000000e-01 : f32
    %355 = vector.broadcast %cst_130 : f32 to vector<8x32xf32>
    %356 = arith.addf %354, %355 : vector<8x32xf32>
    %357 = vector.extract_strided_slice %346 {offsets = [0, 64], sizes = [8, 32], strides = [1, 1]} : vector<8x128xf32> to vector<8x32xf32>
    %358 = vector.extract_strided_slice %346 {offsets = [0, 96], sizes = [8, 32], strides = [1, 1]} : vector<8x128xf32> to vector<8x32xf32>
    %cst_131 = arith.constant 5.000000e-01 : f32
    %359 = vector.broadcast %cst_131 : f32 to vector<8x32xf32>
    %360 = arith.mulf %359, %358 : vector<8x32xf32>
    %cst_132 = arith.constant 5.000000e-01 : f32
    %361 = vector.broadcast %cst_132 : f32 to vector<8x32xf32>
    %362 = arith.addf %360, %361 : vector<8x32xf32>
    %363 = arith.mulf %356, %307 : vector<8x32xf32>
    %364 = arith.mulf %351, %357 : vector<8x32xf32>
    %365 = arith.addf %363, %364 : vector<8x32xf32>
    %366 = math.tanh %365 : vector<8x32xf32>
    %367 = arith.mulf %362, %366 : vector<8x32xf32>
    %368 = arith.truncf %309 : vector<8x32xf32> to vector<8x32xbf16>
    %cst_133 = arith.constant dense<0.000000e+00> : vector<8x128xf32>
    %369 = tpu.matmul %368, %1, %cst_133 {dimension_numbers = #tpu.dot_dimension_numbers<[1], [0], [0], [1], [0, 0, 1, 1], [], []>} : vector<8x32xbf16>, vector<32x128xbf16>, vector<8x128xf32> -> vector<8x128xf32>
    %370 = arith.truncf %337 : vector<8x32xf32> to vector<8x32xbf16>
    %cst_134 = arith.constant dense<0.000000e+00> : vector<8x128xf32>
    %371 = tpu.matmul %370, %3, %cst_134 {dimension_numbers = #tpu.dot_dimension_numbers<[1], [0], [0], [1], [0, 0, 1, 1], [], []>} : vector<8x32xbf16>, vector<32x128xbf16>, vector<8x128xf32> -> vector<8x128xf32>
    %372 = arith.addf %369, %371 : vector<8x128xf32>
    %373 = arith.addf %372, %9 : vector<8x128xf32>
    %374 = math.tanh %373 : vector<8x128xf32>
    %375 = vector.extract_strided_slice %374 {offsets = [0, 0], sizes = [8, 32], strides = [1, 1]} : vector<8x128xf32> to vector<8x32xf32>
    %cst_135 = arith.constant 5.000000e-01 : f32
    %376 = vector.broadcast %cst_135 : f32 to vector<8x32xf32>
    %377 = arith.mulf %376, %375 : vector<8x32xf32>
    %cst_136 = arith.constant 5.000000e-01 : f32
    %378 = vector.broadcast %cst_136 : f32 to vector<8x32xf32>
    %379 = arith.addf %377, %378 : vector<8x32xf32>
    %380 = vector.extract_strided_slice %374 {offsets = [0, 32], sizes = [8, 32], strides = [1, 1]} : vector<8x128xf32> to vector<8x32xf32>
    %cst_137 = arith.constant 5.000000e-01 : f32
    %381 = vector.broadcast %cst_137 : f32 to vector<8x32xf32>
    %382 = arith.mulf %381, %380 : vector<8x32xf32>
    %cst_138 = arith.constant 5.000000e-01 : f32
    %383 = vector.broadcast %cst_138 : f32 to vector<8x32xf32>
    %384 = arith.addf %382, %383 : vector<8x32xf32>
    %385 = vector.extract_strided_slice %374 {offsets = [0, 64], sizes = [8, 32], strides = [1, 1]} : vector<8x128xf32> to vector<8x32xf32>
    %386 = vector.extract_strided_slice %374 {offsets = [0, 96], sizes = [8, 32], strides = [1, 1]} : vector<8x128xf32> to vector<8x32xf32>
    %cst_139 = arith.constant 5.000000e-01 : f32
    %387 = vector.broadcast %cst_139 : f32 to vector<8x32xf32>
    %388 = arith.mulf %387, %386 : vector<8x32xf32>
    %cst_140 = arith.constant 5.000000e-01 : f32
    %389 = vector.broadcast %cst_140 : f32 to vector<8x32xf32>
    %390 = arith.addf %388, %389 : vector<8x32xf32>
    %391 = arith.mulf %384, %335 : vector<8x32xf32>
    %392 = arith.mulf %379, %385 : vector<8x32xf32>
    %393 = arith.addf %391, %392 : vector<8x32xf32>
    %394 = math.tanh %393 : vector<8x32xf32>
    %395 = arith.mulf %390, %394 : vector<8x32xf32>
    %c7 = arith.constant 7 : index
    %c0_141 = arith.constant 0 : index
    %c0_142 = arith.constant 0 : index
    %396 = vector.load %arg1[%c7, %c0_141, %c0_142] : memref<8x8x8xf32, #tpu.memory_space<vmem>>, vector<1x8x8xf32>
    %397 = vector.shape_cast %396 : vector<1x8x8xf32> to vector<8x8xf32>
    %398 = arith.truncf %397 : vector<8x8xf32> to vector<8x8xbf16>
    %cst_143 = arith.constant dense<0.000000e+00> : vector<8x128xf32>
    %399 = tpu.matmul %398, %0, %cst_143 {dimension_numbers = #tpu.dot_dimension_numbers<[1], [0], [0], [1], [0, 0, 1, 1], [], []>} : vector<8x8xbf16>, vector<8x128xbf16>, vector<8x128xf32> -> vector<8x128xf32>
    %400 = arith.truncf %367 : vector<8x32xf32> to vector<8x32xbf16>
    %cst_144 = arith.constant dense<0.000000e+00> : vector<8x128xf32>
    %401 = tpu.matmul %400, %2, %cst_144 {dimension_numbers = #tpu.dot_dimension_numbers<[1], [0], [0], [1], [0, 0, 1, 1], [], []>} : vector<8x32xbf16>, vector<32x128xbf16>, vector<8x128xf32> -> vector<8x128xf32>
    %402 = arith.addf %399, %401 : vector<8x128xf32>
    %403 = arith.addf %402, %6 : vector<8x128xf32>
    %404 = math.tanh %403 : vector<8x128xf32>
    %405 = vector.extract_strided_slice %404 {offsets = [0, 0], sizes = [8, 32], strides = [1, 1]} : vector<8x128xf32> to vector<8x32xf32>
    %cst_145 = arith.constant 5.000000e-01 : f32
    %406 = vector.broadcast %cst_145 : f32 to vector<8x32xf32>
    %407 = arith.mulf %406, %405 : vector<8x32xf32>
    %cst_146 = arith.constant 5.000000e-01 : f32
    %408 = vector.broadcast %cst_146 : f32 to vector<8x32xf32>
    %409 = arith.addf %407, %408 : vector<8x32xf32>
    %410 = vector.extract_strided_slice %404 {offsets = [0, 32], sizes = [8, 32], strides = [1, 1]} : vector<8x128xf32> to vector<8x32xf32>
    %cst_147 = arith.constant 5.000000e-01 : f32
    %411 = vector.broadcast %cst_147 : f32 to vector<8x32xf32>
    %412 = arith.mulf %411, %410 : vector<8x32xf32>
    %cst_148 = arith.constant 5.000000e-01 : f32
    %413 = vector.broadcast %cst_148 : f32 to vector<8x32xf32>
    %414 = arith.addf %412, %413 : vector<8x32xf32>
    %415 = vector.extract_strided_slice %404 {offsets = [0, 64], sizes = [8, 32], strides = [1, 1]} : vector<8x128xf32> to vector<8x32xf32>
    %416 = vector.extract_strided_slice %404 {offsets = [0, 96], sizes = [8, 32], strides = [1, 1]} : vector<8x128xf32> to vector<8x32xf32>
    %cst_149 = arith.constant 5.000000e-01 : f32
    %417 = vector.broadcast %cst_149 : f32 to vector<8x32xf32>
    %418 = arith.mulf %417, %416 : vector<8x32xf32>
    %cst_150 = arith.constant 5.000000e-01 : f32
    %419 = vector.broadcast %cst_150 : f32 to vector<8x32xf32>
    %420 = arith.addf %418, %419 : vector<8x32xf32>
    %421 = arith.mulf %414, %365 : vector<8x32xf32>
    %422 = arith.mulf %409, %415 : vector<8x32xf32>
    %423 = arith.addf %421, %422 : vector<8x32xf32>
    %424 = math.tanh %423 : vector<8x32xf32>
    %425 = arith.mulf %420, %424 : vector<8x32xf32>
    %426 = arith.truncf %367 : vector<8x32xf32> to vector<8x32xbf16>
    %cst_151 = arith.constant dense<0.000000e+00> : vector<8x128xf32>
    %427 = tpu.matmul %426, %1, %cst_151 {dimension_numbers = #tpu.dot_dimension_numbers<[1], [0], [0], [1], [0, 0, 1, 1], [], []>} : vector<8x32xbf16>, vector<32x128xbf16>, vector<8x128xf32> -> vector<8x128xf32>
    %428 = arith.truncf %395 : vector<8x32xf32> to vector<8x32xbf16>
    %cst_152 = arith.constant dense<0.000000e+00> : vector<8x128xf32>
    %429 = tpu.matmul %428, %3, %cst_152 {dimension_numbers = #tpu.dot_dimension_numbers<[1], [0], [0], [1], [0, 0, 1, 1], [], []>} : vector<8x32xbf16>, vector<32x128xbf16>, vector<8x128xf32> -> vector<8x128xf32>
    %430 = arith.addf %427, %429 : vector<8x128xf32>
    %431 = arith.addf %430, %9 : vector<8x128xf32>
    %432 = math.tanh %431 : vector<8x128xf32>
    %433 = vector.extract_strided_slice %432 {offsets = [0, 0], sizes = [8, 32], strides = [1, 1]} : vector<8x128xf32> to vector<8x32xf32>
    %cst_153 = arith.constant 5.000000e-01 : f32
    %434 = vector.broadcast %cst_153 : f32 to vector<8x32xf32>
    %435 = arith.mulf %434, %433 : vector<8x32xf32>
    %cst_154 = arith.constant 5.000000e-01 : f32
    %436 = vector.broadcast %cst_154 : f32 to vector<8x32xf32>
    %437 = arith.addf %435, %436 : vector<8x32xf32>
    %438 = vector.extract_strided_slice %432 {offsets = [0, 32], sizes = [8, 32], strides = [1, 1]} : vector<8x128xf32> to vector<8x32xf32>
    %cst_155 = arith.constant 5.000000e-01 : f32
    %439 = vector.broadcast %cst_155 : f32 to vector<8x32xf32>
    %440 = arith.mulf %439, %438 : vector<8x32xf32>
    %cst_156 = arith.constant 5.000000e-01 : f32
    %441 = vector.broadcast %cst_156 : f32 to vector<8x32xf32>
    %442 = arith.addf %440, %441 : vector<8x32xf32>
    %443 = vector.extract_strided_slice %432 {offsets = [0, 64], sizes = [8, 32], strides = [1, 1]} : vector<8x128xf32> to vector<8x32xf32>
    %444 = vector.extract_strided_slice %432 {offsets = [0, 96], sizes = [8, 32], strides = [1, 1]} : vector<8x128xf32> to vector<8x32xf32>
    %cst_157 = arith.constant 5.000000e-01 : f32
    %445 = vector.broadcast %cst_157 : f32 to vector<8x32xf32>
    %446 = arith.mulf %445, %444 : vector<8x32xf32>
    %cst_158 = arith.constant 5.000000e-01 : f32
    %447 = vector.broadcast %cst_158 : f32 to vector<8x32xf32>
    %448 = arith.addf %446, %447 : vector<8x32xf32>
    %449 = arith.mulf %442, %393 : vector<8x32xf32>
    %450 = arith.mulf %437, %443 : vector<8x32xf32>
    %451 = arith.addf %449, %450 : vector<8x32xf32>
    %452 = math.tanh %451 : vector<8x32xf32>
    %453 = arith.mulf %448, %452 : vector<8x32xf32>
    %454 = arith.truncf %425 : vector<8x32xf32> to vector<8x32xbf16>
    %cst_159 = arith.constant dense<0.000000e+00> : vector<8x128xf32>
    %455 = tpu.matmul %454, %1, %cst_159 {dimension_numbers = #tpu.dot_dimension_numbers<[1], [0], [0], [1], [0, 0, 1, 1], [], []>} : vector<8x32xbf16>, vector<32x128xbf16>, vector<8x128xf32> -> vector<8x128xf32>
    %456 = arith.truncf %453 : vector<8x32xf32> to vector<8x32xbf16>
    %cst_160 = arith.constant dense<0.000000e+00> : vector<8x128xf32>
    %457 = tpu.matmul %456, %3, %cst_160 {dimension_numbers = #tpu.dot_dimension_numbers<[1], [0], [0], [1], [0, 0, 1, 1], [], []>} : vector<8x32xbf16>, vector<32x128xbf16>, vector<8x128xf32> -> vector<8x128xf32>
    %458 = arith.addf %455, %457 : vector<8x128xf32>
    %459 = arith.addf %458, %9 : vector<8x128xf32>
    %460 = math.tanh %459 : vector<8x128xf32>
    %461 = vector.extract_strided_slice %460 {offsets = [0, 0], sizes = [8, 32], strides = [1, 1]} : vector<8x128xf32> to vector<8x32xf32>
    %cst_161 = arith.constant 5.000000e-01 : f32
    %462 = vector.broadcast %cst_161 : f32 to vector<8x32xf32>
    %463 = arith.mulf %462, %461 : vector<8x32xf32>
    %cst_162 = arith.constant 5.000000e-01 : f32
    %464 = vector.broadcast %cst_162 : f32 to vector<8x32xf32>
    %465 = arith.addf %463, %464 : vector<8x32xf32>
    %466 = vector.extract_strided_slice %460 {offsets = [0, 32], sizes = [8, 32], strides = [1, 1]} : vector<8x128xf32> to vector<8x32xf32>
    %cst_163 = arith.constant 5.000000e-01 : f32
    %467 = vector.broadcast %cst_163 : f32 to vector<8x32xf32>
    %468 = arith.mulf %467, %466 : vector<8x32xf32>
    %cst_164 = arith.constant 5.000000e-01 : f32
    %469 = vector.broadcast %cst_164 : f32 to vector<8x32xf32>
    %470 = arith.addf %468, %469 : vector<8x32xf32>
    %471 = vector.extract_strided_slice %460 {offsets = [0, 64], sizes = [8, 32], strides = [1, 1]} : vector<8x128xf32> to vector<8x32xf32>
    %472 = vector.extract_strided_slice %460 {offsets = [0, 96], sizes = [8, 32], strides = [1, 1]} : vector<8x128xf32> to vector<8x32xf32>
    %cst_165 = arith.constant 5.000000e-01 : f32
    %473 = vector.broadcast %cst_165 : f32 to vector<8x32xf32>
    %474 = arith.mulf %473, %472 : vector<8x32xf32>
    %cst_166 = arith.constant 5.000000e-01 : f32
    %475 = vector.broadcast %cst_166 : f32 to vector<8x32xf32>
    %476 = arith.addf %474, %475 : vector<8x32xf32>
    %477 = arith.mulf %470, %451 : vector<8x32xf32>
    %478 = arith.mulf %465, %471 : vector<8x32xf32>
    %479 = arith.addf %477, %478 : vector<8x32xf32>
    %480 = math.tanh %479 : vector<8x32xf32>
    %481 = arith.mulf %476, %480 : vector<8x32xf32>
    %482 = arith.truncf %481 : vector<8x32xf32> to vector<8x32xbf16>
    %c0_167 = arith.constant 0 : index
    %c0_168 = arith.constant 0 : index
    %483 = vector.load %arg10[%c0_167, %c0_168] : memref<32x128xbf16, #tpu.memory_space<vmem>>, vector<32x128xbf16>
    %cst_169 = arith.constant dense<0.000000e+00> : vector<8x128xf32>
    %484 = tpu.matmul %482, %483, %cst_169 {dimension_numbers = #tpu.dot_dimension_numbers<[1], [0], [0], [1], [0, 0, 1, 1], [], []>} : vector<8x32xbf16>, vector<32x128xbf16>, vector<8x128xf32> -> vector<8x128xf32>
    %c0_170 = arith.constant 0 : index
    %c0_171 = arith.constant 0 : index
    %485 = vector.load %arg11[%c0_170, %c0_171] : memref<1x128xf32, #tpu.memory_space<vmem>>, vector<1x128xf32>
    %486 = vector.broadcast %485 : vector<1x128xf32> to vector<8x128xf32>
    %487 = arith.addf %484, %486 : vector<8x128xf32>
    %c0_172 = arith.constant 0 : index
    %c0_173 = arith.constant 0 : index
    %488 = vector.load %arg12[%c0_172, %c0_173] : memref<8x128xf32, #tpu.memory_space<vmem>>, vector<8x128xf32>
    tpu.vector_store %arg12[%c0_172, %c0_173], %487 {strides = array<i32>} : memref<8x128xf32, #tpu.memory_space<vmem>>, vector<8x128xf32>,
    return
  }
  func.func @transform_0(%arg0: i32) -> (i32, i32, i32) {
    %c0_i32 = arith.constant 0 : i32
    %c0_i32_0 = arith.constant 0 : i32
    %c0_i32_1 = arith.constant 0 : i32
    return %c0_i32, %arg0, %c0_i32_0 : i32, i32, i32
  }
  func.func @transform_1(%arg0: i32) -> (i32, i32) {
    %c0_i32 = arith.constant 0 : i32
    %c0_i32_0 = arith.constant 0 : i32
    %c0_i32_1 = arith.constant 0 : i32
    return %c0_i32, %c0_i32_0 : i32, i32
  }
  func.func @transform_2(%arg0: i32) -> (i32, i32) {
    %c0_i32 = arith.constant 0 : i32
    %c0_i32_0 = arith.constant 0 : i32
    %c0_i32_1 = arith.constant 0 : i32
    return %c0_i32, %c0_i32_0 : i32, i32
  }
  func.func @transform_3(%arg0: i32) -> (i32, i32) {
    %c0_i32 = arith.constant 0 : i32
    %c0_i32_0 = arith.constant 0 : i32
    %c0_i32_1 = arith.constant 0 : i32
    return %c0_i32, %c0_i32_0 : i32, i32
  }
  func.func @transform_4(%arg0: i32) -> (i32, i32) {
    %c0_i32 = arith.constant 0 : i32
    %c0_i32_0 = arith.constant 0 : i32
    %c0_i32_1 = arith.constant 0 : i32
    return %c0_i32, %c0_i32_0 : i32, i32
  }
  func.func @transform_5(%arg0: i32) -> (i32, i32) {
    %c0_i32 = arith.constant 0 : i32
    %c0_i32_0 = arith.constant 0 : i32
    %c0_i32_1 = arith.constant 0 : i32
    return %c0_i32, %c0_i32_0 : i32, i32
  }
  func.func @transform_6(%arg0: i32) -> (i32, i32) {
    %c0_i32 = arith.constant 0 : i32
    %c0_i32_0 = arith.constant 0 : i32
    %c0_i32_1 = arith.constant 0 : i32
    return %c0_i32, %c0_i32_0 : i32, i32
  }
  func.func @transform_7(%arg0: i32) -> (i32, i32, i32) {
    %c0_i32 = arith.constant 0 : i32
    %c0_i32_0 = arith.constant 0 : i32
    %c0_i32_1 = arith.constant 0 : i32
    return %c0_i32, %arg0, %c0_i32_0 : i32, i32, i32
  }
  func.func @transform_8(%arg0: i32) -> (i32, i32, i32) {
    %c0_i32 = arith.constant 0 : i32
    %c0_i32_0 = arith.constant 0 : i32
    %c0_i32_1 = arith.constant 0 : i32
    return %c0_i32, %arg0, %c0_i32_0 : i32, i32, i32
  }
  func.func @transform_9(%arg0: i32) -> (i32, i32) {
    %c0_i32 = arith.constant 0 : i32
    %c0_i32_0 = arith.constant 0 : i32
    %c0_i32_1 = arith.constant 0 : i32
    return %c0_i32, %c0_i32_0 : i32, i32
  }
  func.func @transform_10(%arg0: i32) -> (i32, i32) {
    %c0_i32 = arith.constant 0 : i32
    %c0_i32_0 = arith.constant 0 : i32
    %c0_i32_1 = arith.constant 0 : i32
    return %c0_i32, %c0_i32_0 : i32, i32
  }
  func.func @transform_11(%arg0: i32) -> (i32, i32) {
    %c0_i32 = arith.constant 0 : i32
    %c0_i32_0 = arith.constant 0 : i32
    return %arg0, %c0_i32 : i32, i32
  }
}

</mosaic_0001>

<bundles_post_ra>
// kernel: forward.1
= control target key start
LH: loop header
LB: loop body
LE: loop exit
PB: predicated region body
PF: predicated region fallthrough
CT: control target
= control target key end

     0   :  { %vm135_vm0 = vcmask 1043456   ;;  %v2448_v0 = vmov 0.0   ;;  %vm2449_vm1 = vmmov 0   ;;  %vm131_vm2 = vcmask 64512   ;;  %s2450_s28 = smov 64   ;;  %s2451_s12 = smov 32   ;;  %s2966_s2 = inlined_call_operand.vmem [shape: bf16[32,128], index: 2, kind: input, shape index: {}]   ;;  %s2967_s1 = inlined_call_operand.vmem [shape: bf16[8,128], index: 1, kind: input, shape index: {}]   ;;  %s2968_s0 = inlined_call_operand.vmem [shape: f32[8,8,8], index: 0, kind: input, shape index: {}]   ;;  %s2969_s7 = inlined_call_operand.vmem [shape: f32[2,8,32], index: 7, kind: input, shape index: {}]   ;;  %s2970_s3 = inlined_call_operand.vmem [shape: f32[1,128], index: 3, kind: input, shape index: {}]   ;;  %s2971_s8 = inlined_call_operand.vmem [shape: f32[2,8,32], index: 8, kind: input, shape index: {}]   ;;  %s2972_s4 = inlined_call_operand.vmem [shape: bf16[32,128], index: 4, kind: input, shape index: {}]   ;;  %s2973_s5 = inlined_call_operand.vmem [shape: bf16[32,128], index: 5, kind: input, shape index: {}]   ;;  %s2974_s6 = inlined_call_operand.vmem [shape: f32[1,128], index: 6, kind: input, shape index: {}]   ;;  %s2975_s9 = inlined_call_operand.vmem [shape: bf16[32,128], index: 9, kind: input, shape index: {}]   ;;  %s2976_s10 = inlined_call_operand.vmem [shape: f32[1,128], index: 10, kind: input, shape index: {}]   ;;  %s2977_s11 = inlined_call_operand.vmem [shape: f32[8,128], index: 11, kind: output, shape index: {}]  }
   0x1   :  { %2117 = vmatprep.subr.bf16.mxu0 %v2448_v0  ;;  %v2516_v1 = vld [vmem:[%s2966_s2] sm:$0xff]   ;;  %2125 = vmatprep.subr.bf16.mxu1 %v2448_v0  ;;  %v2532_v4 = vld [vmem:[%s2966_s2 + $0x8] sm:$0xff]   ;;  %vm87_vm3 = vcmask 261120  }
   0x2   :  { %v39_v2 = vld [vmem:[%s2967_s1] sm:$0xf]  ;;  %2127 = vmatprep.mubr.msk.bf16.mxu1 %vm2449_vm1, %v2448_v0  ;;  %2121 = vmatprep.mubr.msk.bf16.mxu0 %vm2449_vm1, %v2448_v0  ;;  %v1981_v30 = vld [vmem:[%s2968_s0 + $0x8] sm:$0xff] }
   0x3   :  { %2118 = vmatpush3.bf16.msra.mxu0 %v2516_v1  ;;  %v2527_v3 = vsel %vm135_vm0, %v39_v2, 0  ;;  %v72_v5 = vld [vmem:[%s2968_s0] sm:$0xff]  ;;  %v206_v31 = vpack.c.bf16 %v1981_v30, %v1981_v30  ;;  %v2585_v33 = vld [vmem:[%s2972_s4 + $0x8] sm:$0xff]  }
   0x4   :  { %v66_v6 = vld [vmem:[%s2969_s7] sm:$0xff]  ;;  %2126 = vmatpush3.bf16.msra.mxu1 %v2527_v3  ;;  %2119 = vmatprep.subr.bf16.mxu0 %v2448_v0  ;;  %v73_v7 = vpack.c.bf16 %v72_v5, %v72_v5  ;;  %v1975_v44 = vld [vmem:[%s2969_s7 + $0x8] sm:$0xff] }
   0x5   :  { %2131 = vmatprep.subr.bf16.mxu1 %v2448_v0  ;;  %v74_v8 = vpack.c.bf16 %v66_v6, %v66_v6  ;;  %v2560_v12 = vld [vmem:[%s2970_s3] ss:$0 sm:$0xff]  ;;  %v2608_v45 = vld [vmem:[%s2973_s5 + $0x8] sm:$0xff]   ;;  %v318_v46 = vpack.c.bf16 %v1975_v44, %v1975_v44 }
   0x6   :  { %v69_v21 = vld [vmem:[%s2971_s8] sm:$0xff]  ;;  %v1976_v6 = vld [vmem:[%s2971_s8 + $0x8] sm:$0xff] }
   0x7   :  { %2120 = vmatpush3.bf16.msra.mxu0 %v2532_v4  ;;  %2128 = vmatmul.mubr.msk.bf16.vlgmr.msra.gmra.mrb[0].mxu1 %vm131_vm2, %v73_v7  ;;  %v2578_v32 = vld [vmem:[%s2972_s4] sm:$0xff]  }
   0x8   :  { %2139 = vmatprep.subr.bf16.mxu0 %v2448_v0  ;;  %2132 = vmatpush3.bf16.msra.mxu1 %v2516_v1  ;;  %v2597_v42 = vld [vmem:[%s2973_s5] sm:$0xff]  }
   0x9   :  { %2133 = vmatprep.subr.bf16.mxu1 %v2448_v0  ;;  %2135 = vmatprep.mubr.msk.bf16.mxu1 %vm2449_vm1, %v2448_v0  ;;  %v2630_v57 = vld [vmem:[%s2974_s6] ss:$0 sm:$0xff] }
   0xa   :  { %2122 = vmatmul.mubr.msk.bf16.vlgmr.msra.gmra.mrb[0].mxu0 %vm87_vm3, %v74_v8 }
   0xb   :  { %2140 = vmatpush3.bf16.msra.mxu0 %v2527_v3  ;;  %2141 = vmatprep.mubr.msk.bf16.mxu0 %vm2449_vm1, %v2448_v0 }
   0xc   :  { %2153 = vmatprep.subr.bf16.mxu0 %v2448_v0  ;;  %2134 = vmatpush3.bf16.msra.mxu1 %v2532_v4 }
   0xd   :  { %2145 = vmatprep.subr.bf16.mxu1 %v2448_v0 }
  0x12   :  { %2142 = vmatmul.mubr.msk.bf16.vlgmr.msra.gmra.mrb[4].mxu0 %vm131_vm2, %v206_v31 }
  0x13   :  { %2154 = vmatpush3.bf16.msra.mxu0 %v2578_v32  ;;  %2157 = vmatprep.mubr.msk.bf16.mxu0 %vm2449_vm1, %v2448_v0 }
  0x14   :  { %2155 = vmatprep.subr.bf16.mxu0 %v2448_v0 }
  0x17   :  { %2156 = vmatpush3.bf16.msra.mxu0 %v2585_v33 }
  0x18   :  { %2169 = vmatprep.subr.bf16.mxu0 %v2448_v0 }
  0xda   :  { %v173_v9 = vpop.f32.mrb[0].mxu1 }
  0xdb   :  { %v2129_v10 = vpop.f32.mrb[1].mxu1 }
  0xdc   :  { %v176_v11 = vpop.f32.mrb[2].mxu1 }
  0xdd   :  { %v125_v13 = vpop.f32.mrb[0].mxu0  ;;  %v2130_v14 = vpop.f32.mrb[3].mxu1 }
  0xde   :  { %v174_v15 = vadd.f32 %v173_v9, %v125_v13  ;;  %v2123_v16 = vpop.f32.mrb[1].mxu0 }
  0xdf   :  { %v128_v17 = vpop.f32.mrb[2].mxu0 }
  0xe0   :  { %v179_v18 = vadd.f32 %v2560_v12, %v174_v15  ;;  %v2124_v19 = vpop.f32.mrb[3].mxu0 }
  0xe2   :  { %2377 = vtanh.f32 %v179_v18 }
  0xe5   :  { %v291_v38 = vpop.f32.mrb[4].mxu0 }
  0xe6   :  { %v2143_v39 = vpop.f32.mrb[5].mxu0 }
  0xe7   :  { %v294_v40 = vpop.f32.mrb[6].mxu0 }
  0xe8   :  { %v2144_v41 = vpop.f32.mrb[7].mxu0 }
  0xec   :  { %v2378_v20 = vpop.eup %2377 }
  0xed   :  { %189 = vrot.lane.b32.xlu0 %v2378_v20, %s2450_s28  ;;  %v181_v22 = vmul.f32 0.5, %v2378_v20 }
  0xef   :  { %v182_v23 = vadd.f32 0.5, %v181_v22 }
  0xf1   :  { %184 = vrot.lane.b32.xlu0 %v69_v21, %s2451_s12 }
 0x15f   :  { %v190_v24 = vpop.permute.xlu0 %189 }
 0x160   :  { %v192_v25 = vmul.f32 %v190_v24, %v182_v23  ;;  %v1990_v24 = vld [vmem:[%s2968_s0 + $0x10] sm:$0xff] }
 0x162   :  { %194 = vrot.lane.b32.xlu1 %v192_v25, %s2451_s12  ;;  %v453_v25 = vpack.c.bf16 %v1990_v24, %v1990_v24 }
 0x163   :  { %v185_v26 = vpop.permute.xlu0 %184 }
 0x164   :  { %v187_v27 = vmul.f32 %v185_v26, %v182_v23 }
 0x1d4   :  { %v195_v28 = vpop.permute.xlu1 %194 }
 0x1d5   :  { %v2569_v29 = vadd.f32 %v195_v28, %v187_v27 }
 0x1d7   :  { %2379 = vtanh.f32 %v2569_v29 }
 0x1e1   :  { %v2380_v34 = vpop.eup %2379 }
 0x1e2   :  { %200 = vrot.lane.b32.xlu1 %v2380_v34, %s2450_s28 }
 0x254   :  { %v201_v35 = vpop.permute.xlu1 %200 }
 0x255   :  { %v203_v36 = vmul.f32 %v201_v35, %v182_v23 }
 0x257   :  { %v207_v37 = vpack.c.bf16 %v203_v36, %v203_v36 }
 0x259   :  { %209 = vrot.lane.b32.xlu0 %v207_v37, %s2451_s12 }
 0x2cb   :  { %v210_v43 = vpop.permute.xlu0 %209 }
 0x2cc   :  { %2136 = vmatmul.mubr.msk.bf16.vlgmr.msra.gmra.mrb[4].mxu1 %vm87_vm3, %v210_v43  ;;  %2158 = vmatmul.mubr.msk.bf16.vlgmr.msra.gmra.mrb[8].mxu0 %vm87_vm3, %v210_v43 }
 0x2cd   :  { %2146 = vmatpush3.bf16.msra.mxu1 %v2597_v42  ;;  %2149 = vmatprep.mubr.msk.bf16.mxu1 %vm2449_vm1, %v2448_v0 }
 0x2ce   :  { %2147 = vmatprep.subr.bf16.mxu1 %v2448_v0  ;;  %2170 = vmatpush3.bf16.msra.mxu0 %v2527_v3 }
 0x2cf   :  { %2171 = vmatprep.mubr.msk.bf16.mxu0 %vm2449_vm1, %v2448_v0  ;;  %2183 = vmatprep.subr.bf16.mxu0 %v2448_v0 }
 0x2d1   :  { %2148 = vmatpush3.bf16.msra.mxu1 %v2608_v45 }
 0x2d2   :  { %2161 = vmatprep.subr.bf16.mxu1 %v2448_v0 }
 0x2d4   :  { %2150 = vmatmul.mubr.msk.bf16.vlgmr.msra.gmra.mrb[8].mxu1 %vm87_vm3, %v318_v46  ;;  %2172 = vmatmul.mubr.msk.bf16.vlgmr.msra.gmra.mrb[12].mxu0 %vm131_vm2, %v453_v25 }
 0x2d5   :  { %2162 = vmatpush3.bf16.msra.mxu1 %v2516_v1  ;;  %2165 = vmatprep.mubr.msk.bf16.mxu1 %vm2449_vm1, %v2448_v0 }
 0x2d6   :  { %2163 = vmatprep.subr.bf16.mxu1 %v2448_v0  ;;  %2184 = vmatpush3.bf16.msra.mxu0 %v2578_v32 }
 0x2d7   :  { %2187 = vmatprep.mubr.msk.bf16.mxu0 %vm2449_vm1, %v2448_v0  ;;  %2185 = vmatprep.subr.bf16.mxu0 %v2448_v0 }
 0x2d9   :  { %2164 = vmatpush3.bf16.msra.mxu1 %v2532_v4 }
 0x2da   :  { %2175 = vmatprep.subr.bf16.mxu1 %v2448_v0  ;;  %2186 = vmatpush3.bf16.msra.mxu0 %v2585_v33 }
 0x2db   :  { %2199 = vmatprep.subr.bf16.mxu0 %v2448_v0 }
 0x39f   :  { %v248_v47 = vpop.f32.mrb[4].mxu1  ;;  %v420_v48 = vpop.f32.mrb[8].mxu0 }
 0x3a0   :  { %v292_v49 = vadd.f32 %v291_v38, %v248_v47  ;;  %v2137_v50 = vpop.f32.mrb[5].mxu1  ;;  %v2159_v51 = vpop.f32.mrb[9].mxu0 }
 0x3a1   :  { %v251_v52 = vpop.f32.mrb[6].mxu1  ;;  %v423_v53 = vpop.f32.mrb[10].mxu0 }
 0x3a2   :  { %v297_v54 = vadd.f32 %v2560_v12, %v292_v49  ;;  %v2138_v55 = vpop.f32.mrb[7].mxu1  ;;  %v2160_v56 = vpop.f32.mrb[11].mxu0 }
 0x3a4   :  { %2381 = vtanh.f32 %v297_v54 }
 0x3a7   :  { %v368_v58 = vpop.f32.mrb[8].mxu1  ;;  %v538_v35 = vpop.f32.mrb[12].mxu0 }
 0x3a8   :  { %v421_v59 = vadd.f32 %v420_v48, %v368_v58  ;;  %v2151_v60 = vpop.f32.mrb[9].mxu1  ;;  %v2173_v36 = vpop.f32.mrb[13].mxu0 }
 0x3a9   :  { %v371_v61 = vpop.f32.mrb[10].mxu1  ;;  %v541_v37 = vpop.f32.mrb[14].mxu0 }
 0x3aa   :  { %v426_v62 = vadd.f32 %v2630_v57, %v421_v59  ;;  %v2152_v63 = vpop.f32.mrb[11].mxu1  ;;  %v2174_v38 = vpop.f32.mrb[15].mxu0 }
 0x3ac   :  { %2383 = vtanh.f32 %v426_v62 }
 0x3ae   :  { %v2382_v2 = vpop.eup %2381 }
 0x3af   :  { %303 = vrot.lane.b32.xlu1 %v2382_v2, %s2450_s28  ;;  %v299_v7 = vmul.f32 0.5, %v2382_v2 }
 0x3b1   :  { %v300_v8 = vadd.f32 0.5, %v299_v7 }
 0x3b3   :  { %v301_v16 = vmul.f32 %v300_v8, %v2569_v29 }
 0x3b6   :  { %v2384_v5 = vpop.eup %2383 }
 0x3b7   :  { %436 = vrot.lane.b32.xlu0 %v2384_v5, %s2450_s28  ;;  %v428_v11 = vmul.f32 0.5, %v2384_v5 }
 0x3b9   :  { %v429_v13 = vadd.f32 0.5, %v428_v11 }
 0x3bb   :  { %431 = vrot.lane.b32.xlu0 %v1976_v6, %s2451_s12 }
 0x421   :  { %v304_v9 = vpop.permute.xlu1 %303 }
 0x422   :  { %v306_v10 = vmul.f32 %v304_v9, %v300_v8 }
 0x424   :  { %308 = vrot.lane.b32.xlu1 %v306_v10, %s2451_s12 }
 0x429   :  { %v437_v14 = vpop.permute.xlu0 %436 }
 0x42a   :  { %v439_v15 = vmul.f32 %v437_v14, %v429_v13 }
 0x42c   :  { %441 = vrot.lane.b32.xlu1 %v439_v15, %s2451_s12 }
 0x42d   :  { %v432_v19 = vpop.permute.xlu0 %431 }
 0x42e   :  { %v434_v20 = vmul.f32 %v432_v19, %v429_v13  ;;  %v1995_v19 = vld [vmem:[%s2968_s0 + $0x18] sm:$0xff] }
 0x496   :  { %v309_v17 = vpop.permute.xlu1 %308 }
 0x497   :  { %v2642_v18 = vadd.f32 %v309_v17, %v301_v16 }
 0x499   :  { %2385 = vtanh.f32 %v2642_v18 }
 0x49e   :  { %v442_v21 = vpop.permute.xlu1 %441 }
 0x49f   :  { %v2645_v22 = vadd.f32 %v442_v21, %v434_v20 }
 0x4a1   :  { %2387 = vtanh.f32 %v2645_v22 }
 0x4a3   :  { %v2386_v23 = vpop.eup %2385 }
 0x4a4   :  { %314 = vrot.lane.b32.xlu0 %v2386_v23, %s2450_s28 }
 0x4ab   :  { %v2388_v26 = vpop.eup %2387 }
 0x4ac   :  { %447 = vrot.lane.b32.xlu1 %v2388_v26, %s2450_s28 }
 0x516   :  { %v315_v27 = vpop.permute.xlu0 %314 }
 0x517   :  { %v317_v28 = vmul.f32 %v315_v27, %v300_v8 }
 0x519   :  { %v454_v29 = vpack.c.bf16 %v317_v28, %v317_v28 }
 0x51b   :  { %456 = vrot.lane.b32.xlu0 %v454_v29, %s2451_s12 }
 0x51e   :  { %v448_v30 = vpop.permute.xlu1 %447 }
 0x51f   :  { %v450_v31 = vmul.f32 %v448_v30, %v429_v13 }
 0x521   :  { %v565_v34 = vpack.c.bf16 %v450_v31, %v450_v31 }
 0x523   :  { %567 = vrot.lane.b32.xlu1 %v565_v34, %s2451_s12 }
 0x58d   :  { %v457_v39 = vpop.permute.xlu0 %456 }
 0x58e   :  { %2166 = vmatmul.mubr.msk.bf16.vlgmr.msra.gmra.mrb[12].mxu1 %vm87_vm3, %v457_v39  ;;  %2188 = vmatmul.mubr.msk.bf16.vlgmr.msra.gmra.mrb[16].mxu0 %vm87_vm3, %v457_v39 }
 0x58f   :  { %2176 = vmatpush3.bf16.msra.mxu1 %v2597_v42  ;;  %2179 = vmatprep.mubr.msk.bf16.mxu1 %vm2449_vm1, %v2448_v0 }
 0x590   :  { %2177 = vmatprep.subr.bf16.mxu1 %v2448_v0  ;;  %2200 = vmatpush3.bf16.msra.mxu0 %v2527_v3 }
 0x591   :  { %2201 = vmatprep.mubr.msk.bf16.mxu0 %vm2449_vm1, %v2448_v0  ;;  %2213 = vmatprep.subr.bf16.mxu0 %v2448_v0 }
 0x593   :  { %2178 = vmatpush3.bf16.msra.mxu1 %v2608_v45 }
 0x594   :  { %2191 = vmatprep.subr.bf16.mxu1 %v2448_v0 }
 0x595   :  { %v568_v40 = vpop.permute.xlu1 %567 }
 0x596   :  { %2180 = vmatmul.mubr.msk.bf16.vlgmr.msra.gmra.mrb[16].mxu1 %vm87_vm3, %v568_v40 }
 0x597   :  { %2192 = vmatpush3.bf16.msra.mxu1 %v2516_v1  ;;  %2195 = vmatprep.mubr.msk.bf16.mxu1 %vm2449_vm1, %v2448_v0 }
 0x598   :  { %2193 = vmatprep.subr.bf16.mxu1 %v2448_v0 }
 0x59b   :  { %2194 = vmatpush3.bf16.msra.mxu1 %v2532_v4 }
 0x59c   :  { %2205 = vmatprep.subr.bf16.mxu1 %v2448_v0 }
 0x661   :  { %v495_v41 = vpop.f32.mrb[12].mxu1  ;;  %v646_v43 = vpop.f32.mrb[16].mxu0 }
 0x662   :  { %v539_v44 = vadd.f32 %v538_v35, %v495_v41  ;;  %v2167_v46 = vpop.f32.mrb[13].mxu1  ;;  %v2189_v47 = vpop.f32.mrb[17].mxu0 }
 0x663   :  { %v498_v48 = vpop.f32.mrb[14].mxu1  ;;  %v649_v49 = vpop.f32.mrb[18].mxu0 }
 0x664   :  { %v544_v50 = vadd.f32 %v2560_v12, %v539_v44  ;;  %v2168_v51 = vpop.f32.mrb[15].mxu1  ;;  %v2190_v52 = vpop.f32.mrb[19].mxu0 }
 0x666   :  { %2389 = vtanh.f32 %v544_v50 }
 0x669   :  { %v606_v53 = vpop.f32.mrb[16].mxu1 }
 0x66a   :  { %v647_v54 = vadd.f32 %v646_v43, %v606_v53  ;;  %v2181_v55 = vpop.f32.mrb[17].mxu1 }
 0x66b   :  { %v609_v56 = vpop.f32.mrb[18].mxu1 }
 0x66c   :  { %v652_v58 = vadd.f32 %v2630_v57, %v647_v54  ;;  %v2182_v59 = vpop.f32.mrb[19].mxu1 }
 0x66e   :  { %2391 = vtanh.f32 %v652_v58 }
 0x670   :  { %v2390_v60 = vpop.eup %2389 }
 0x671   :  { %550 = vrot.lane.b32.xlu0 %v2390_v60, %s2450_s28  ;;  %v546_v62 = vmul.f32 0.5, %v2390_v60 }
 0x673   :  { %v547_v63 = vadd.f32 0.5, %v546_v62 }
 0x675   :  { %v548_v10 = vmul.f32 %v547_v63, %v2642_v18  ;;  %v675_v18 = vpack.c.bf16 %v1995_v19, %v1995_v19 }
 0x677   :  { %2202 = vmatmul.mubr.msk.bf16.vlgmr.msra.gmra.mrb[20].mxu0 %vm131_vm2, %v675_v18 }
 0x678   :  { %v2392_v61 = vpop.eup %2391  ;;  %2214 = vmatpush3.bf16.msra.mxu0 %v2578_v32  ;;  %2217 = vmatprep.mubr.msk.bf16.mxu0 %vm2449_vm1, %v2448_v0 }
 0x679   :  { %658 = vrot.lane.b32.xlu1 %v2392_v61, %s2450_s28  ;;  %v654_v6 = vmul.f32 0.5, %v2392_v61  ;;  %2215 = vmatprep.subr.bf16.mxu0 %v2448_v0 }
 0x67b   :  { %v655_v7 = vadd.f32 0.5, %v654_v6 }
 0x67c   :  { %2216 = vmatpush3.bf16.msra.mxu0 %v2585_v33 }
 0x67d   :  { %v656_v14 = vmul.f32 %v655_v7, %v2645_v22  ;;  %2229 = vmatprep.subr.bf16.mxu0 %v2448_v0 }
 0x6e3   :  { %v551_v2 = vpop.permute.xlu0 %550 }
 0x6e4   :  { %v553_v5 = vmul.f32 %v551_v2, %v547_v63 }
 0x6e6   :  { %555 = vrot.lane.b32.xlu0 %v553_v5, %s2451_s12 }
 0x6eb   :  { %v659_v8 = vpop.permute.xlu1 %658 }
 0x6ec   :  { %v661_v9 = vmul.f32 %v659_v8, %v655_v7 }
 0x6ee   :  { %663 = vrot.lane.b32.xlu1 %v661_v9, %s2451_s12 }
 0x74a   :  { %v760_v27 = vpop.f32.mrb[20].mxu0 }
 0x74b   :  { %v2203_v28 = vpop.f32.mrb[21].mxu0 }
 0x74c   :  { %v763_v29 = vpop.f32.mrb[22].mxu0 }
 0x74d   :  { %v2204_v30 = vpop.f32.mrb[23].mxu0 }
 0x758   :  { %v556_v11 = vpop.permute.xlu0 %555 }
 0x759   :  { %v2688_v13 = vadd.f32 %v556_v11, %v548_v10  ;;  %v2000_v11 = vld [vmem:[%s2968_s0 + $0x20] sm:$0xff] }
 0x75b   :  { %2393 = vtanh.f32 %v2688_v13 }
 0x760   :  { %v664_v15 = vpop.permute.xlu1 %663 }
 0x761   :  { %v2692_v16 = vadd.f32 %v664_v15, %v656_v14 }
 0x763   :  { %2395 = vtanh.f32 %v2692_v16 }
 0x765   :  { %v2394_v17 = vpop.eup %2393 }
 0x766   :  { %561 = vrot.lane.b32.xlu0 %v2394_v17, %s2450_s28 }
 0x76d   :  { %v2396_v20 = vpop.eup %2395 }
 0x76e   :  { %669 = vrot.lane.b32.xlu1 %v2396_v20, %s2450_s28 }
 0x7d8   :  { %v562_v21 = vpop.permute.xlu0 %561 }
 0x7d9   :  { %v564_v22 = vmul.f32 %v562_v21, %v547_v63 }
 0x7db   :  { %v676_v23 = vpack.c.bf16 %v564_v22, %v564_v22 }
 0x7dd   :  { %678 = vrot.lane.b32.xlu0 %v676_v23, %s2451_s12 }
 0x7e0   :  { %v670_v24 = vpop.permute.xlu1 %669 }
 0x7e1   :  { %v672_v25 = vmul.f32 %v670_v24, %v655_v7 }
 0x7e3   :  { %v787_v26 = vpack.c.bf16 %v672_v25, %v672_v25 }
 0x7e5   :  { %789 = vrot.lane.b32.xlu1 %v787_v26, %s2451_s12 }
 0x84f   :  { %v679_v31 = vpop.permute.xlu0 %678 }
 0x850   :  { %2196 = vmatmul.mubr.msk.bf16.vlgmr.msra.gmra.mrb[20].mxu1 %vm87_vm3, %v679_v31  ;;  %2218 = vmatmul.mubr.msk.bf16.vlgmr.msra.gmra.mrb[24].mxu0 %vm87_vm3, %v679_v31 }
 0x851   :  { %2206 = vmatpush3.bf16.msra.mxu1 %v2597_v42  ;;  %2209 = vmatprep.mubr.msk.bf16.mxu1 %vm2449_vm1, %v2448_v0 }
 0x852   :  { %2207 = vmatprep.subr.bf16.mxu1 %v2448_v0  ;;  %2230 = vmatpush3.bf16.msra.mxu0 %v2527_v3 }
 0x853   :  { %2231 = vmatprep.mubr.msk.bf16.mxu0 %vm2449_vm1, %v2448_v0  ;;  %2243 = vmatprep.subr.bf16.mxu0 %v2448_v0 }
 0x855   :  { %2208 = vmatpush3.bf16.msra.mxu1 %v2608_v45 }
 0x856   :  { %2221 = vmatprep.subr.bf16.mxu1 %v2448_v0 }
 0x857   :  { %v790_v34 = vpop.permute.xlu1 %789 }
 0x858   :  { %2210 = vmatmul.mubr.msk.bf16.vlgmr.msra.gmra.mrb[24].mxu1 %vm87_vm3, %v790_v34 }
 0x859   :  { %2222 = vmatpush3.bf16.msra.mxu1 %v2516_v1  ;;  %2225 = vmatprep.mubr.msk.bf16.mxu1 %vm2449_vm1, %v2448_v0 }
 0x85a   :  { %2223 = vmatprep.subr.bf16.mxu1 %v2448_v0 }
 0x85d   :  { %2224 = vmatpush3.bf16.msra.mxu1 %v2532_v4 }
 0x85e   :  { %2235 = vmatprep.subr.bf16.mxu1 %v2448_v0 }
 0x923   :  { %v717_v35 = vpop.f32.mrb[20].mxu1  ;;  %v868_v36 = vpop.f32.mrb[24].mxu0 }
 0x924   :  { %v761_v37 = vadd.f32 %v760_v27, %v717_v35  ;;  %v2197_v38 = vpop.f32.mrb[21].mxu1  ;;  %v2219_v39 = vpop.f32.mrb[25].mxu0 }
 0x925   :  { %v720_v40 = vpop.f32.mrb[22].mxu1  ;;  %v871_v41 = vpop.f32.mrb[26].mxu0 }
 0x926   :  { %v766_v43 = vadd.f32 %v2560_v12, %v761_v37  ;;  %v2198_v44 = vpop.f32.mrb[23].mxu1  ;;  %v2220_v46 = vpop.f32.mrb[27].mxu0 }
 0x928   :  { %2397 = vtanh.f32 %v766_v43 }
 0x92b   :  { %v828_v47 = vpop.f32.mrb[24].mxu1 }
 0x92c   :  { %v869_v48 = vadd.f32 %v868_v36, %v828_v47  ;;  %v2211_v49 = vpop.f32.mrb[25].mxu1 }
 0x92d   :  { %v831_v50 = vpop.f32.mrb[26].mxu1 }
 0x92e   :  { %v874_v51 = vadd.f32 %v2630_v57, %v869_v48  ;;  %v2212_v52 = vpop.f32.mrb[27].mxu1 }
 0x930   :  { %2399 = vtanh.f32 %v874_v51 }
 0x932   :  { %v2398_v53 = vpop.eup %2397 }
 0x933   :  { %772 = vrot.lane.b32.xlu0 %v2398_v53, %s2450_s28  ;;  %v768_v55 = vmul.f32 0.5, %v2398_v53 }
 0x935   :  { %v769_v56 = vadd.f32 0.5, %v768_v55 }
 0x937   :  { %v770_v2 = vmul.f32 %v769_v56, %v2688_v13  ;;  %v897_v13 = vpack.c.bf16 %v2000_v11, %v2000_v11 }
 0x939   :  { %2232 = vmatmul.mubr.msk.bf16.vlgmr.msra.gmra.mrb[28].mxu0 %vm131_vm2, %v897_v13 }
 0x93a   :  { %v2400_v54 = vpop.eup %2399  ;;  %2244 = vmatpush3.bf16.msra.mxu0 %v2578_v32  ;;  %2247 = vmatprep.mubr.msk.bf16.mxu0 %vm2449_vm1, %v2448_v0 }
 0x93b   :  { %880 = vrot.lane.b32.xlu1 %v2400_v54, %s2450_s28  ;;  %v876_v60 = vmul.f32 0.5, %v2400_v54  ;;  %2245 = vmatprep.subr.bf16.mxu0 %v2448_v0 }
 0x93d   :  { %v877_v61 = vadd.f32 0.5, %v876_v60 }
 0x93e   :  { %2246 = vmatpush3.bf16.msra.mxu0 %v2585_v33 }
 0x93f   :  { %v878_v7 = vmul.f32 %v877_v61, %v2692_v16  ;;  %2259 = vmatprep.subr.bf16.mxu0 %v2448_v0 }
 0x9a5   :  { %v773_v58 = vpop.permute.xlu0 %772 }
 0x9a6   :  { %v775_v59 = vmul.f32 %v773_v58, %v769_v56 }
 0x9a8   :  { %777 = vrot.lane.b32.xlu0 %v775_v59, %s2451_s12 }
 0x9ad   :  { %v881_v62 = vpop.permute.xlu1 %880 }
 0x9ae   :  { %v883_v63 = vmul.f32 %v881_v62, %v877_v61 }
 0x9b0   :  { %885 = vrot.lane.b32.xlu1 %v883_v63, %s2451_s12 }
 0xa0c   :  { %v982_v21 = vpop.f32.mrb[28].mxu0 }
 0xa0d   :  { %v2233_v22 = vpop.f32.mrb[29].mxu0 }
 0xa0e   :  { %v985_v23 = vpop.f32.mrb[30].mxu0 }
 0xa0f   :  { %v2234_v24 = vpop.f32.mrb[31].mxu0 }
 0xa1a   :  { %v778_v5 = vpop.permute.xlu0 %777 }
 0xa1b   :  { %v2735_v6 = vadd.f32 %v778_v5, %v770_v2  ;;  %v2005_v5 = vld [vmem:[%s2968_s0 + $0x28] sm:$0xff] }
 0xa1d   :  { %2401 = vtanh.f32 %v2735_v6 }
 0xa22   :  { %v886_v8 = vpop.permute.xlu1 %885 }
 0xa23   :  { %v2739_v9 = vadd.f32 %v886_v8, %v878_v7 }
 0xa25   :  { %2403 = vtanh.f32 %v2739_v9 }
 0xa27   :  { %v2402_v10 = vpop.eup %2401 }
 0xa28   :  { %783 = vrot.lane.b32.xlu0 %v2402_v10, %s2450_s28 }
 0xa2f   :  { %v2404_v14 = vpop.eup %2403 }
 0xa30   :  { %891 = vrot.lane.b32.xlu1 %v2404_v14, %s2450_s28 }
 0xa9a   :  { %v784_v15 = vpop.permute.xlu0 %783 }
 0xa9b   :  { %v786_v16 = vmul.f32 %v784_v15, %v769_v56 }
 0xa9d   :  { %v898_v17 = vpack.c.bf16 %v786_v16, %v786_v16 }
 0xa9f   :  { %900 = vrot.lane.b32.xlu0 %v898_v17, %s2451_s12 }
 0xaa2   :  { %v892_v19 = vpop.permute.xlu1 %891 }
 0xaa3   :  { %v894_v18 = vmul.f32 %v892_v19, %v877_v61 }
 0xaa5   :  { %v1009_v20 = vpack.c.bf16 %v894_v18, %v894_v18 }
 0xaa7   :  { %1011 = vrot.lane.b32.xlu1 %v1009_v20, %s2451_s12 }
 0xb11   :  { %v901_v25 = vpop.permute.xlu0 %900 }
 0xb12   :  { %2226 = vmatmul.mubr.msk.bf16.vlgmr.msra.gmra.mrb[28].mxu1 %vm87_vm3, %v901_v25  ;;  %2248 = vmatmul.mubr.msk.bf16.vlgmr.msra.gmra.mrb[32].mxu0 %vm87_vm3, %v901_v25 }
 0xb13   :  { %2236 = vmatpush3.bf16.msra.mxu1 %v2597_v42  ;;  %2239 = vmatprep.mubr.msk.bf16.mxu1 %vm2449_vm1, %v2448_v0 }
 0xb14   :  { %2237 = vmatprep.subr.bf16.mxu1 %v2448_v0  ;;  %2260 = vmatpush3.bf16.msra.mxu0 %v2527_v3 }
 0xb15   :  { %2261 = vmatprep.mubr.msk.bf16.mxu0 %vm2449_vm1, %v2448_v0  ;;  %2273 = vmatprep.subr.bf16.mxu0 %v2448_v0 }
 0xb17   :  { %2238 = vmatpush3.bf16.msra.mxu1 %v2608_v45 }
 0xb18   :  { %2251 = vmatprep.subr.bf16.mxu1 %v2448_v0 }
 0xb19   :  { %v1012_v26 = vpop.permute.xlu1 %1011 }
 0xb1a   :  { %2240 = vmatmul.mubr.msk.bf16.vlgmr.msra.gmra.mrb[32].mxu1 %vm87_vm3, %v1012_v26 }
 0xb1b   :  { %2252 = vmatpush3.bf16.msra.mxu1 %v2516_v1  ;;  %2255 = vmatprep.mubr.msk.bf16.mxu1 %vm2449_vm1, %v2448_v0 }
 0xb1c   :  { %2253 = vmatprep.subr.bf16.mxu1 %v2448_v0 }
 0xb1f   :  { %2254 = vmatpush3.bf16.msra.mxu1 %v2532_v4 }
 0xb20   :  { %2265 = vmatprep.subr.bf16.mxu1 %v2448_v0 }
 0xbe5   :  { %v939_v27 = vpop.f32.mrb[28].mxu1  ;;  %v1090_v28 = vpop.f32.mrb[32].mxu0 }
 0xbe6   :  { %v983_v29 = vadd.f32 %v982_v21, %v939_v27  ;;  %v2227_v30 = vpop.f32.mrb[29].mxu1  ;;  %v2249_v31 = vpop.f32.mrb[33].mxu0 }
 0xbe7   :  { %v942_v34 = vpop.f32.mrb[30].mxu1  ;;  %v1093_v35 = vpop.f32.mrb[34].mxu0 }
 0xbe8   :  { %v988_v36 = vadd.f32 %v2560_v12, %v983_v29  ;;  %v2228_v37 = vpop.f32.mrb[31].mxu1  ;;  %v2250_v38 = vpop.f32.mrb[35].mxu0 }
 0xbea   :  { %2405 = vtanh.f32 %v988_v36 }
 0xbed   :  { %v1050_v39 = vpop.f32.mrb[32].mxu1 }
 0xbee   :  { %v1091_v40 = vadd.f32 %v1090_v28, %v1050_v39  ;;  %v2241_v41 = vpop.f32.mrb[33].mxu1 }
 0xbef   :  { %v1053_v43 = vpop.f32.mrb[34].mxu1 }
 0xbf0   :  { %v1096_v44 = vadd.f32 %v2630_v57, %v1091_v40  ;;  %v2242_v46 = vpop.f32.mrb[35].mxu1 }
 0xbf2   :  { %2407 = vtanh.f32 %v1096_v44 }
 0xbf4   :  { %v2406_v47 = vpop.eup %2405 }
 0xbf5   :  { %994 = vrot.lane.b32.xlu0 %v2406_v47, %s2450_s28  ;;  %v990_v49 = vmul.f32 0.5, %v2406_v47 }
 0xbf7   :  { %v991_v50 = vadd.f32 0.5, %v990_v49 }
 0xbf9   :  { %v992_v58 = vmul.f32 %v991_v50, %v2735_v6  ;;  %v1119_v6 = vpack.c.bf16 %v2005_v5, %v2005_v5 }
 0xbfb   :  { %2262 = vmatmul.mubr.msk.bf16.vlgmr.msra.gmra.mrb[36].mxu0 %vm131_vm2, %v1119_v6 }
 0xbfc   :  { %v2408_v48 = vpop.eup %2407  ;;  %2274 = vmatpush3.bf16.msra.mxu0 %v2578_v32  ;;  %2277 = vmatprep.mubr.msk.bf16.mxu0 %vm2449_vm1, %v2448_v0 }
 0xbfd   :  { %1102 = vrot.lane.b32.xlu1 %v2408_v48, %s2450_s28  ;;  %v1098_v53 = vmul.f32 0.5, %v2408_v48  ;;  %2275 = vmatprep.subr.bf16.mxu0 %v2448_v0 }
 0xbff   :  { %v1099_v54 = vadd.f32 0.5, %v1098_v53 }
 0xc00   :  { %2276 = vmatpush3.bf16.msra.mxu0 %v2585_v33 }
 0xc01   :  { %v1100_v61 = vmul.f32 %v1099_v54, %v2739_v9  ;;  %2289 = vmatprep.subr.bf16.mxu0 %v2448_v0 }
 0xc67   :  { %v995_v51 = vpop.permute.xlu0 %994 }
 0xc68   :  { %v997_v52 = vmul.f32 %v995_v51, %v991_v50 }
 0xc6a   :  { %999 = vrot.lane.b32.xlu0 %v997_v52, %s2451_s12 }
 0xc6f   :  { %v1103_v55 = vpop.permute.xlu1 %1102 }
 0xc70   :  { %v1105_v56 = vmul.f32 %v1103_v55, %v1099_v54 }
 0xc72   :  { %1107 = vrot.lane.b32.xlu1 %v1105_v56, %s2451_s12  ;;  %v2010_v56 = vld [vmem:[%s2968_s0 + $0x30] sm:$0xff] }
 0xcce   :  { %v1204_v15 = vpop.f32.mrb[36].mxu0 }
 0xccf   :  { %v2263_v16 = vpop.f32.mrb[37].mxu0 }
 0xcd0   :  { %v1207_v17 = vpop.f32.mrb[38].mxu0 }
 0xcd1   :  { %v2264_v19 = vpop.f32.mrb[39].mxu0 }
 0xcdc   :  { %v1000_v59 = vpop.permute.xlu0 %999 }
 0xcdd   :  { %v2782_v60 = vadd.f32 %v1000_v59, %v992_v58  ;;  %v1341_v58 = vpack.c.bf16 %v2010_v56, %v2010_v56 }
 0xcdf   :  { %2409 = vtanh.f32 %v2782_v60 }
 0xce4   :  { %v1108_v62 = vpop.permute.xlu1 %1107 }
 0xce5   :  { %v2786_v63 = vadd.f32 %v1108_v62, %v1100_v61 }
 0xce7   :  { %2411 = vtanh.f32 %v2786_v63 }
 0xce9   :  { %v2410_v2 = vpop.eup %2409 }
 0xcea   :  { %1005 = vrot.lane.b32.xlu0 %v2410_v2, %s2450_s28 }
 0xcf1   :  { %v2412_v7 = vpop.eup %2411 }
 0xcf2   :  { %1113 = vrot.lane.b32.xlu1 %v2412_v7, %s2450_s28 }
 0xd5c   :  { %v1006_v8 = vpop.permute.xlu0 %1005 }
 0xd5d   :  { %v1008_v9 = vmul.f32 %v1006_v8, %v991_v50 }
 0xd5f   :  { %v1120_v10 = vpack.c.bf16 %v1008_v9, %v1008_v9 }
 0xd61   :  { %1122 = vrot.lane.b32.xlu0 %v1120_v10, %s2451_s12 }
 0xd64   :  { %v1114_v11 = vpop.permute.xlu1 %1113 }
 0xd65   :  { %v1116_v13 = vmul.f32 %v1114_v11, %v1099_v54 }
 0xd67   :  { %v1231_v14 = vpack.c.bf16 %v1116_v13, %v1116_v13  ;;  %v2441_v13 = vld [vmem:[%s2966_s2] sm:$0xff]  }
 0xd69   :  { %1233 = vrot.lane.b32.xlu1 %v1231_v14, %s2451_s12 }
 0xdd3   :  { %v1123_v18 = vpop.permute.xlu0 %1122 }
 0xdd4   :  { %2256 = vmatmul.mubr.msk.bf16.vlgmr.msra.gmra.mrb[36].mxu1 %vm87_vm3, %v1123_v18  ;;  %2278 = vmatmul.mubr.msk.bf16.vlgmr.msra.gmra.mrb[40].mxu0 %vm87_vm3, %v1123_v18 }
 0xdd5   :  { %2266 = vmatpush3.bf16.msra.mxu1 %v2597_v42  ;;  %2269 = vmatprep.mubr.msk.bf16.mxu1 %vm2449_vm1, %v2448_v0 }
 0xdd6   :  { %2267 = vmatprep.subr.bf16.mxu1 %v2448_v0  ;;  %2290 = vmatpush3.bf16.msra.mxu0 %v2527_v3 }
 0xdd7   :  { %2291 = vmatprep.mubr.msk.bf16.mxu0 %vm2449_vm1, %v2448_v0  ;;  %2303 = vmatprep.subr.bf16.mxu0 %v2448_v0 }
 0xdd9   :  { %2268 = vmatpush3.bf16.msra.mxu1 %v2608_v45 }
 0xdda   :  { %2281 = vmatprep.subr.bf16.mxu1 %v2448_v0 }
 0xddb   :  { %v1234_v20 = vpop.permute.xlu1 %1233 }
 0xddc   :  { %2270 = vmatmul.mubr.msk.bf16.vlgmr.msra.gmra.mrb[40].mxu1 %vm87_vm3, %v1234_v20  ;;  %2292 = vmatmul.mubr.msk.bf16.vlgmr.msra.gmra.mrb[44].mxu0 %vm131_vm2, %v1341_v58 }
 0xddd   :  { %2282 = vmatpush3.bf16.msra.mxu1 %v2516_v1  ;;  %2285 = vmatprep.mubr.msk.bf16.mxu1 %vm2449_vm1, %v2448_v0 }
 0xdde   :  { %2283 = vmatprep.subr.bf16.mxu1 %v2448_v0  ;;  %2304 = vmatpush3.bf16.msra.mxu0 %v2578_v32 }
 0xddf   :  { %2307 = vmatprep.mubr.msk.bf16.mxu0 %vm2449_vm1, %v2448_v0  ;;  %2305 = vmatprep.subr.bf16.mxu0 %v2448_v0 }
 0xde1   :  { %2284 = vmatpush3.bf16.msra.mxu1 %v2532_v4 }
 0xde2   :  { %2295 = vmatprep.subr.bf16.mxu1 %v2448_v0  ;;  %2306 = vmatpush3.bf16.msra.mxu0 %v2585_v33 }
 0xde3   :  { %2319 = vmatprep.subr.bf16.mxu0 %v2448_v0 }
 0xea7   :  { %v1161_v21 = vpop.f32.mrb[36].mxu1  ;;  %v1312_v22 = vpop.f32.mrb[40].mxu0 }
 0xea8   :  { %v1205_v23 = vadd.f32 %v1204_v15, %v1161_v21  ;;  %v2257_v24 = vpop.f32.mrb[37].mxu1  ;;  %v2279_v25 = vpop.f32.mrb[41].mxu0 }
 0xea9   :  { %v1164_v26 = vpop.f32.mrb[38].mxu1  ;;  %v1315_v27 = vpop.f32.mrb[42].mxu0 }
 0xeaa   :  { %v1210_v28 = vadd.f32 %v2560_v12, %v1205_v23  ;;  %v2258_v29 = vpop.f32.mrb[39].mxu1  ;;  %v2280_v1 = vpop.f32.mrb[43].mxu0 }
 0xeac   :  { %2413 = vtanh.f32 %v1210_v28 }
 0xeaf   :  { %v1272_v30 = vpop.f32.mrb[40].mxu1  ;;  %v1426_v6 = vpop.f32.mrb[44].mxu0 }
 0xeb0   :  { %v1313_v31 = vadd.f32 %v1312_v22, %v1272_v30  ;;  %v2271_v34 = vpop.f32.mrb[41].mxu1  ;;  %v2293_v7 = vpop.f32.mrb[45].mxu0 }
 0xeb1   :  { %v1275_v35 = vpop.f32.mrb[42].mxu1  ;;  %v1429_v8 = vpop.f32.mrb[46].mxu0 }
 0xeb2   :  { %v1318_v4 = vadd.f32 %v2630_v57, %v1313_v31  ;;  %v2272_v36 = vpop.f32.mrb[43].mxu1  ;;  %v2294_v9 = vpop.f32.mrb[47].mxu0 }
 0xeb4   :  { %2415 = vtanh.f32 %v1318_v4 }
 0xeb6   :  { %v2414_v37 = vpop.eup %2413 }
 0xeb7   :  { %1216 = vrot.lane.b32.xlu0 %v2414_v37, %s2450_s28  ;;  %v1212_v39 = vmul.f32 0.5, %v2414_v37 }
 0xeb9   :  { %v1213_v40 = vadd.f32 0.5, %v1212_v39 }
 0xebb   :  { %v1214_v49 = vmul.f32 %v1213_v40, %v2782_v60 }
 0xebe   :  { %v2416_v38 = vpop.eup %2415 }
 0xebf   :  { %1324 = vrot.lane.b32.xlu1 %v2416_v38, %s2450_s28  ;;  %v1320_v44 = vmul.f32 0.5, %v2416_v38 }
 0xec1   :  { %v1321_v46 = vadd.f32 0.5, %v1320_v44 }
 0xec3   :  { %v1322_v52 = vmul.f32 %v1321_v46, %v2786_v63 }
 0xf29   :  { %v1217_v41 = vpop.permute.xlu0 %1216 }
 0xf2a   :  { %v1219_v43 = vmul.f32 %v1217_v41, %v1213_v40 }
 0xf2c   :  { %1221 = vrot.lane.b32.xlu0 %v1219_v43, %s2451_s12 }
 0xf31   :  { %v1325_v47 = vpop.permute.xlu1 %1324 }
 0xf32   :  { %v1327_v48 = vmul.f32 %v1325_v47, %v1321_v46 }
 0xf34   :  { %1329 = vrot.lane.b32.xlu1 %v1327_v48, %s2451_s12  ;;  %v2015_v48 = vld [vmem:[%s2968_s0 + $0x38] sm:$0xff] }
 0xf9e   :  { %v1222_v50 = vpop.permute.xlu0 %1221 }
 0xf9f   :  { %v2829_v51 = vadd.f32 %v1222_v50, %v1214_v49  ;;  %v1563_v49 = vpack.c.bf16 %v2015_v48, %v2015_v48 }
 0xfa1   :  { %2417 = vtanh.f32 %v2829_v51 }
 0xfa6   :  { %v1330_v53 = vpop.permute.xlu1 %1329 }
 0xfa7   :  { %v2833_v54 = vadd.f32 %v1330_v53, %v1322_v52 }
 0xfa9   :  { %2419 = vtanh.f32 %v2833_v54 }
 0xfab   :  { %v2418_v55 = vpop.eup %2417 }
 0xfac   :  { %1227 = vrot.lane.b32.xlu0 %v2418_v55, %s2450_s28 }
 0xfb3   :  { %v2420_v59 = vpop.eup %2419 }
 0xfb4   :  { %1335 = vrot.lane.b32.xlu1 %v2420_v59, %s2450_s28 }
0x101e   :  { %v1228_v60 = vpop.permute.xlu0 %1227 }
0x101f   :  { %v1230_v61 = vmul.f32 %v1228_v60, %v1213_v40 }
0x1021   :  { %v1342_v62 = vpack.c.bf16 %v1230_v61, %v1230_v61 }
0x1023   :  { %1344 = vrot.lane.b32.xlu0 %v1342_v62, %s2451_s12 }
0x1026   :  { %v1336_v63 = vpop.permute.xlu1 %1335 }
0x1027   :  { %v1338_v2 = vmul.f32 %v1336_v63, %v1321_v46  ;;  %v2445_v63 = vld [vmem:[%s2973_s5] sm:$0xff]  }
0x1029   :  { %v1453_v5 = vpack.c.bf16 %v1338_v2, %v1338_v2 }
0x102b   :  { %1455 = vrot.lane.b32.xlu1 %v1453_v5, %s2451_s12 }
0x1095   :  { %v1345_v10 = vpop.permute.xlu0 %1344 }
0x1096   :  { %2286 = vmatmul.mubr.msk.bf16.vlgmr.msra.gmra.mrb[44].mxu1 %vm87_vm3, %v1345_v10  ;;  %2308 = vmatmul.mubr.msk.bf16.vlgmr.msra.gmra.mrb[48].mxu0 %vm87_vm3, %v1345_v10 }
0x1097   :  { %2296 = vmatpush3.bf16.msra.mxu1 %v2597_v42  ;;  %2299 = vmatprep.mubr.msk.bf16.mxu1 %vm2449_vm1, %v2448_v0 }
0x1098   :  { %2297 = vmatprep.subr.bf16.mxu1 %v2448_v0  ;;  %2320 = vmatpush3.bf16.msra.mxu0 %v2527_v3  ;;  %v2442_v3 = vld [vmem:[%s2966_s2 + $0x8] sm:$0xff]  }
0x1099   :  { %2321 = vmatprep.mubr.msk.bf16.mxu0 %vm2449_vm1, %v2448_v0  ;;  %2333 = vmatprep.subr.bf16.mxu0 %v2448_v0 }
0x109b   :  { %2298 = vmatpush3.bf16.msra.mxu1 %v2608_v45 }
0x109c   :  { %2311 = vmatprep.subr.bf16.mxu1 %v2448_v0 }
0x109d   :  { %v1456_v11 = vpop.permute.xlu1 %1455 }
0x109e   :  { %2300 = vmatmul.mubr.msk.bf16.vlgmr.msra.gmra.mrb[48].mxu1 %vm87_vm3, %v1456_v11  ;;  %2322 = vmatmul.mubr.msk.bf16.vlgmr.msra.gmra.mrb[52].mxu0 %vm131_vm2, %v1563_v49  ;;  %v2446_v11 = vld [vmem:[%s2970_s3] ss:$0 sm:$0xff] }
0x109f   :  { %2312 = vmatpush3.bf16.msra.mxu1 %v2441_v13  ;;  %2315 = vmatprep.mubr.msk.bf16.mxu1 %vm2449_vm1, %v2448_v0 }
0x10a0   :  { %2313 = vmatprep.subr.bf16.mxu1 %v2448_v0  ;;  %2334 = vmatpush3.bf16.msra.mxu0 %v2578_v32 }
0x10a1   :  { %2337 = vmatprep.mubr.msk.bf16.mxu0 %vm2449_vm1, %v2448_v0  ;;  %2335 = vmatprep.subr.bf16.mxu0 %v2448_v0 }
0x10a3   :  { %2314 = vmatpush3.bf16.msra.mxu1 %v2442_v3 }
0x10a4   :  { %2325 = vmatprep.subr.bf16.mxu1 %v2448_v0  ;;  %2336 = vmatpush3.bf16.msra.mxu0 %v2585_v33  ;;  %v2443_v33 = vld [vmem:[%s2972_s4] sm:$0xff]  }
0x10a5   :  { %2349 = vmatprep.subr.bf16.mxu0 %v2448_v0 }
0x1169   :  { %v1383_v14 = vpop.f32.mrb[44].mxu1  ;;  %v1534_v15 = vpop.f32.mrb[48].mxu0 }
0x116a   :  { %v1427_v16 = vadd.f32 %v1426_v6, %v1383_v14  ;;  %v2287_v17 = vpop.f32.mrb[45].mxu1  ;;  %v2309_v19 = vpop.f32.mrb[49].mxu0 }
0x116b   :  { %v1386_v18 = vpop.f32.mrb[46].mxu1  ;;  %v1537_v20 = vpop.f32.mrb[50].mxu0 }
0x116c   :  { %v1432_v21 = vadd.f32 %v2560_v12, %v1427_v16  ;;  %v2288_v22 = vpop.f32.mrb[47].mxu1  ;;  %v2310_v23 = vpop.f32.mrb[51].mxu0 }
0x116e   :  { %2421 = vtanh.f32 %v1432_v21 }
0x1171   :  { %v1494_v24 = vpop.f32.mrb[48].mxu1  ;;  %v1648_v56 = vpop.f32.mrb[52].mxu0 }
0x1172   :  { %v1535_v25 = vadd.f32 %v1534_v15, %v1494_v24  ;;  %v2301_v26 = vpop.f32.mrb[49].mxu1  ;;  %v2323_v58 = vpop.f32.mrb[53].mxu0 }
0x1173   :  { %v1497_v27 = vpop.f32.mrb[50].mxu1  ;;  %v1651_v59 = vpop.f32.mrb[54].mxu0 }
0x1174   :  { %v1540_v28 = vadd.f32 %v2630_v57, %v1535_v25  ;;  %v2302_v29 = vpop.f32.mrb[51].mxu1  ;;  %v2324_v60 = vpop.f32.mrb[55].mxu0 }
0x1176   :  { %2423 = vtanh.f32 %v1540_v28 }
0x1178   :  { %v2422_v1 = vpop.eup %2421 }
0x1179   :  { %1438 = vrot.lane.b32.xlu0 %v2422_v1, %s2450_s28  ;;  %v1434_v31 = vmul.f32 0.5, %v2422_v1 }
0x117b   :  { %v1435_v34 = vadd.f32 0.5, %v1434_v31 }
0x117d   :  { %v1436_v39 = vmul.f32 %v1435_v34, %v2829_v51 }
0x1180   :  { %v2424_v30 = vpop.eup %2423 }
0x1181   :  { %1546 = vrot.lane.b32.xlu1 %v2424_v30, %s2450_s28  ;;  %v1542_v4 = vmul.f32 0.5, %v2424_v30 }
0x1183   :  { %v1543_v36 = vadd.f32 0.5, %v1542_v4 }
0x1185   :  { %v1544_v43 = vmul.f32 %v1543_v36, %v2833_v54 }
0x11eb   :  { %v1439_v12 = vpop.permute.xlu0 %1438 }
0x11ec   :  { %v1441_v35 = vmul.f32 %v1439_v12, %v1435_v34 }
0x11ee   :  { %1443 = vrot.lane.b32.xlu0 %v1441_v35, %s2451_s12 }
0x11f3   :  { %v1547_v37 = vpop.permute.xlu1 %1546 }
0x11f4   :  { %v1549_v38 = vmul.f32 %v1547_v37, %v1543_v36 }
0x11f6   :  { %1551 = vrot.lane.b32.xlu1 %v1549_v38, %s2451_s12 }
0x1260   :  { %v1444_v40 = vpop.permute.xlu0 %1443 }
0x1261   :  { %v2880_v41 = vadd.f32 %v1444_v40, %v1436_v39 }
0x1263   :  { %2425 = vtanh.f32 %v2880_v41 }
0x1268   :  { %v1552_v44 = vpop.permute.xlu1 %1551 }
0x1269   :  { %v2884_v46 = vadd.f32 %v1552_v44, %v1544_v43 }
0x126b   :  { %2427 = vtanh.f32 %v2884_v46 }
0x126d   :  { %v2426_v47 = vpop.eup %2425 }
0x126e   :  { %1449 = vrot.lane.b32.xlu0 %v2426_v47, %s2450_s28 }
0x1275   :  { %v2428_v50 = vpop.eup %2427 }
0x1276   :  { %1557 = vrot.lane.b32.xlu1 %v2428_v50, %s2450_s28 }
0x12e0   :  { %v1450_v51 = vpop.permute.xlu0 %1449 }
0x12e1   :  { %v1452_v52 = vmul.f32 %v1450_v51, %v1435_v34 }
0x12e3   :  { %v1564_v53 = vpack.c.bf16 %v1452_v52, %v1452_v52 }
0x12e5   :  { %1566 = vrot.lane.b32.xlu0 %v1564_v53, %s2451_s12 }
0x12e8   :  { %v1558_v54 = vpop.permute.xlu1 %1557 }
0x12e9   :  { %v1560_v55 = vmul.f32 %v1558_v54, %v1543_v36  ;;  %v2447_v54 = vld [vmem:[%s2974_s6] ss:$0 sm:$0xff] }
0x12eb   :  { %v1675_v32 = vpack.c.bf16 %v1560_v55, %v1560_v55 }
0x12ed   :  { %1677 = vrot.lane.b32.xlu1 %v1675_v32, %s2451_s12 }
0x1357   :  { %v1567_v61 = vpop.permute.xlu0 %1566 }
0x1358   :  { %2316 = vmatmul.mubr.msk.bf16.vlgmr.msra.gmra.mrb[52].mxu1 %vm87_vm3, %v1567_v61  ;;  %2338 = vmatmul.mubr.msk.bf16.vlgmr.msra.gmra.mrb[56].mxu0 %vm87_vm3, %v1567_v61 }
0x1359   :  { %2326 = vmatpush3.bf16.msra.mxu1 %v2597_v42  ;;  %2329 = vmatprep.mubr.msk.bf16.mxu1 %vm2449_vm1, %v2448_v0  ;;  %v2444_v42 = vld [vmem:[%s2972_s4 + $0x8] sm:$0xff]  }
0x135a   :  { %2327 = vmatprep.subr.bf16.mxu1 %v2448_v0  ;;  %2350 = vmatpush3.bf16.msra.mxu0 %v2443_v33 }
0x135b   :  { %2351 = vmatprep.subr.bf16.mxu0 %v2448_v0  ;;  %2353 = vmatprep.mubr.msk.bf16.mxu0 %vm2449_vm1, %v2448_v0 }
0x135d   :  { %2328 = vmatpush3.bf16.msra.mxu1 %v2608_v45 }
0x135e   :  { %2352 = vmatpush3.bf16.msra.mxu0 %v2444_v42  ;;  %2341 = vmatprep.subr.bf16.mxu1 %v2448_v0 }
0x135f   :  { %v1678_v62 = vpop.permute.xlu1 %1677 }
0x1360   :  { %2330 = vmatmul.mubr.msk.bf16.vlgmr.msra.gmra.mrb[56].mxu1 %vm87_vm3, %v1678_v62 }
0x1361   :  { %2342 = vmatpush3.bf16.msra.mxu1 %v2445_v63  ;;  %2345 = vmatprep.mubr.msk.bf16.mxu1 %vm2449_vm1, %v2448_v0  ;;  %v2375_v63 = vld [vmem:[%s2975_s9] sm:$0xff]  }
0x1362   :  { %2343 = vmatprep.subr.bf16.mxu1 %v2448_v0 }
0x1365   :  { %2344 = vmatpush3.bf16.msra.mxu1 %v2608_v45 }
0x1366   :  { %2357 = vmatprep.subr.bf16.mxu1 %v2448_v0 }
0x142b   :  { %v1605_v2 = vpop.f32.mrb[52].mxu1  ;;  %v1756_v5 = vpop.f32.mrb[56].mxu0 }
0x142c   :  { %v1649_v6 = vadd.f32 %v1648_v56, %v1605_v2  ;;  %v2317_v7 = vpop.f32.mrb[53].mxu1  ;;  %v2339_v8 = vpop.f32.mrb[57].mxu0  ;;  %v2376_v2 = vld [vmem:[%s2975_s9 + $0x8] sm:$0xff]  }
0x142d   :  { %v1608_v9 = vpop.f32.mrb[54].mxu1  ;;  %v1759_v10 = vpop.f32.mrb[58].mxu0 }
0x142e   :  { %v1654_v13 = vadd.f32 %v2446_v11, %v1649_v6  ;;  %v2318_v3 = vpop.f32.mrb[55].mxu1  ;;  %v2340_v14 = vpop.f32.mrb[59].mxu0  ;;  %v2022_v10 = vld [vmem:[%s2976_s10] ss:$0 sm:$0xff] }
0x1430   :  { %2429 = vtanh.f32 %v1654_v13 }
0x1433   :  { %v1716_v15 = vpop.f32.mrb[56].mxu1 }
0x1434   :  { %v1757_v16 = vadd.f32 %v1756_v5, %v1716_v15  ;;  %v2331_v45 = vpop.f32.mrb[57].mxu1 }
0x1435   :  { %v1719_v17 = vpop.f32.mrb[58].mxu1 }
0x1436   :  { %v1762_v19 = vadd.f32 %v2630_v57, %v1757_v16  ;;  %v2332_v18 = vpop.f32.mrb[59].mxu1 }
0x1438   :  { %2431 = vtanh.f32 %v1762_v19 }
0x143a   :  { %v2430_v20 = vpop.eup %2429 }
0x143b   :  { %1660 = vrot.lane.b32.xlu0 %v2430_v20, %s2450_s28  ;;  %v1656_v22 = vmul.f32 0.5, %v2430_v20 }
0x143d   :  { %v1657_v23 = vadd.f32 0.5, %v1656_v22 }
0x143f   :  { %v1658_v57 = vmul.f32 %v1657_v23, %v2880_v41 }
0x1442   :  { %v2432_v21 = vpop.eup %2431 }
0x1443   :  { %1768 = vrot.lane.b32.xlu1 %v2432_v21, %s2450_s28  ;;  %v1764_v26 = vmul.f32 0.5, %v2432_v21 }
0x1445   :  { %v1765_v27 = vadd.f32 0.5, %v1764_v26 }
0x1447   :  { %v1766_v31 = vmul.f32 %v1765_v27, %v2884_v46 }
0x14ad   :  { %v1661_v24 = vpop.permute.xlu0 %1660 }
0x14ae   :  { %v1663_v25 = vmul.f32 %v1661_v24, %v1657_v23 }
0x14b0   :  { %1665 = vrot.lane.b32.xlu0 %v1663_v25, %s2451_s12 }
0x14b5   :  { %v1769_v28 = vpop.permute.xlu1 %1768 }
0x14b6   :  { %v1771_v29 = vmul.f32 %v1769_v28, %v1765_v27 }
0x14b8   :  { %1773 = vrot.lane.b32.xlu1 %v1771_v29, %s2451_s12 }
0x1522   :  { %v1666_v1 = vpop.permute.xlu0 %1665 }
0x1523   :  { %v1668_v30 = vadd.f32 %v1666_v1, %v1658_v57 }
0x1525   :  { %2433 = vtanh.f32 %v1668_v30 }
0x152a   :  { %v1774_v34 = vpop.permute.xlu1 %1773 }
0x152b   :  { %v1776_v12 = vadd.f32 %v1774_v34, %v1766_v31 }
0x152d   :  { %2435 = vtanh.f32 %v1776_v12 }
0x152f   :  { %v2434_v35 = vpop.eup %2433 }
0x1530   :  { %1671 = vrot.lane.b32.xlu0 %v2434_v35, %s2450_s28 }
0x1537   :  { %v2436_v4 = vpop.eup %2435 }
0x1538   :  { %1779 = vrot.lane.b32.xlu1 %v2436_v4, %s2450_s28 }
0x15a2   :  { %v1672_v36 = vpop.permute.xlu0 %1671 }
0x15a3   :  { %v1674_v37 = vmul.f32 %v1672_v36, %v1657_v23 }
0x15a5   :  { %v1783_v38 = vpack.c.bf16 %v1674_v37, %v1674_v37 }
0x15a7   :  { %1832 = vrot.lane.b32.xlu1 %v1783_v38, %s2451_s12 }
0x15aa   :  { %v1780_v39 = vpop.permute.xlu1 %1779 }
0x15ab   :  { %v1782_v40 = vmul.f32 %v1780_v39, %v1765_v27 }
0x15ad   :  { %v1784_v41 = vpack.c.bf16 %v1782_v40, %v1782_v40 }
0x15af   :  { %1786 = vrot.lane.b32.xlu0 %v1784_v41, %s2451_s12 }
0x1619   :  { %v1833_v43 = vpop.permute.xlu1 %1832 }
0x161a   :  { %2354 = vmatmul.mubr.msk.bf16.vlgmr.msra.gmra.mrb[60].mxu0 %vm87_vm3, %v1833_v43 }
0x1621   :  { %v1787_v44 = vpop.permute.xlu0 %1786 }
0x1622   :  { %2346 = vmatmul.mubr.msk.bf16.vlgmr.msra.gmra.mrb[60].mxu1 %vm87_vm3, %v1787_v44 }
0x1623   :  { %2361 = vmatprep.mubr.msk.bf16.mxu1 %vm2449_vm1, %v2448_v0  ;;  %2358 = vmatpush3.bf16.msra.mxu1 %v2375_v63 }
0x1624   :  { %2359 = vmatprep.subr.bf16.mxu1 %v2448_v0 }
0x1627   :  { %2360 = vmatpush3.bf16.msra.mxu1 %v2376_v2 }
0x16ed   :  { %v1871_v46 = vpop.f32.mrb[60].mxu0 }
0x16ee   :  { %v2355_v47 = vpop.f32.mrb[61].mxu0 }
0x16ef   :  { %v1874_v48 = vpop.f32.mrb[62].mxu0 }
0x16f0   :  { %v2356_v49 = vpop.f32.mrb[63].mxu0 }
0x16f5   :  { %v1825_v50 = vpop.f32.mrb[60].mxu1 }
0x16f6   :  { %v1872_v51 = vadd.f32 %v1871_v46, %v1825_v50  ;;  %v2347_v52 = vpop.f32.mrb[61].mxu1 }
0x16f7   :  { %v1828_v53 = vpop.f32.mrb[62].mxu1 }
0x16f8   :  { %v1877_v55 = vadd.f32 %v2447_v54, %v1872_v51  ;;  %v2348_v32 = vpop.f32.mrb[63].mxu1 }
0x16fa   :  { %2437 = vtanh.f32 %v1877_v55 }
0x1704   :  { %v2438_v56 = vpop.eup %2437 }
0x1705   :  { %1883 = vrot.lane.b32.xlu0 %v2438_v56, %s2450_s28  ;;  %v1879_v58 = vmul.f32 0.5, %v2438_v56 }
0x1707   :  { %v1880_v59 = vadd.f32 0.5, %v1879_v58 }
0x1709   :  { %v1881_v33 = vmul.f32 %v1880_v59, %v1776_v12 }
0x1777   :  { %v1884_v60 = vpop.permute.xlu0 %1883 }
0x1778   :  { %v1886_v61 = vmul.f32 %v1884_v60, %v1880_v59 }
0x177a   :  { %1888 = vrot.lane.b32.xlu1 %v1886_v61, %s2451_s12 }
0x17ec   :  { %v1889_v42 = vpop.permute.xlu1 %1888 }
0x17ed   :  { %v1891_v62 = vadd.f32 %v1889_v42, %v1881_v33 }
0x17ef   :  { %2439 = vtanh.f32 %v1891_v62 }
0x17f9   :  { %v2440_v5 = vpop.eup %2439 }
0x17fa   :  { %1894 = vrot.lane.b32.xlu0 %v2440_v5, %s2450_s28 }
0x186c   :  { %v1895_v6 = vpop.permute.xlu0 %1894 }
0x186d   :  { %v1897_v7 = vmul.f32 %v1895_v6, %v1880_v59 }
0x186f   :  { %v1898_v8 = vpack.c.bf16 %v1897_v7, %v1897_v7 }
0x1871   :  { %1911 = vrot.lane.b32.xlu1 %v1898_v8, %s2451_s12 }
0x18e3   :  { %v1912_v9 = vpop.permute.xlu1 %1911 }
0x18e4   :  { %2362 = vmatmul.mubr.msk.bf16.vlgmr.msra.gmra.mrb[64].mxu1 %vm87_vm3, %v1912_v9 }
0x19b7   :  { %v1962_v11 = vpop.f32.mrb[64].mxu1 }
0x19b8   :  { %v1963_v13 = vadd.f32 %v2022_v10, %v1962_v11  ;;  %v2363_v3 = vpop.f32.mrb[65].mxu1 }
0x19b9   :  { %v1965_v0 = vpop.f32.mrb[66].mxu1 }
0x19ba   :  { %1968 = vst [vmem:[%s2977_s11] sm:$0xff] %v1963_v13  ;;  %v2364_v14 = vpop.f32.mrb[67].mxu1 }

</bundles_post_ra>
